<compile_context>
chip_gen: v6e
topology: v6e:2x2x1
jax: 0.10.0
libtpu: 0.0.40
codegen_flags: <defaults>
</compile_context>

<pallas_src>
import functools

import jax
import jax.numpy as jnp
from jax import lax
from jax.experimental import pallas as pl
from jax.experimental.pallas import tpu as pltpu


def _manager_kernel(dil_ref,
                    z_ref, mask_ref, hx0_ref, cx0_ref,
                    w_space_ref, b_space_ref,
                    w_ih_ref, w_hh_ref, b_gates_ref,
                    w_critic_ref, b_critic_ref,
                    packed_ref, hx_ref, cx_ref,
                    state_sc, gx_sc, gh_sc,
                    *, unroll):
    c = pl.program_id(0)
    t_chunk, B, _ = mask_ref.shape
    r, _, d = hx_ref.shape
    pack_w = packed_ref.shape[-1]

    # hx_ref / cx_ref have a constant block index over the whole grid, so they
    # stay resident in VMEM and act as the recurrent carry.  Seed them once.
    @pl.when(c == 0)
    def _():
        hx_ref[...] = hx0_ref[...]
        cx_ref[...] = cx0_ref[...]

    # ---- chunk prologue: batched non-recurrent projections (off serial chain)
    z2 = z_ref[...]                                           # (t_chunk*B, d)
    state2 = jnp.maximum(
        jnp.dot(z2, w_space_ref[...], preferred_element_type=jnp.float32)
        + b_space_ref[...], 0.0)
    state_sc[...] = state2
    gx_sc[...] = (jnp.dot(state2, w_ih_ref[...],
                          preferred_element_type=jnp.float32)
                  + b_gates_ref[...])                         # (t_chunk*B, 4d)

    inv_r = 1.0 / float(r)
    base = c * t_chunk

    # ---- serial recurrence: only the true per-step dependency chain ---------
    def step(t, carry):
        dil = dil_ref[base + t]                               # dilation slot (SMEM)
        row = pl.multiple_of(t * B, B)
        m = mask_ref[t]                                       # (B, 1)

        h_prev = hx_ref[dil] * m                              # (B, d) dynamic slot
        c_prev = cx_ref[dil] * m
        hx_masked = hx_ref[...] * m                           # (r, B, d)
        cx_masked = cx_ref[...] * m
        hx_sum = jnp.sum(hx_masked, axis=0)                   # (B, d)

        # LSTMCell on slot `dil` (gate order i,f,g,o); x-projection was hoisted.
        gates = gx_sc[pl.ds(row, B), :] + jnp.dot(
            h_prev, w_hh_ref[...], preferred_element_type=jnp.float32)
        sig = jax.nn.sigmoid(gates)                           # one EUP push, full vreg
        tnh = jnp.tanh(gates)                                 # one EUP push, full vreg
        i_g = sig[:, 0:d]
        f_g = sig[:, d:2 * d]
        g_g = tnh[:, 2 * d:3 * d]
        o_g = sig[:, 3 * d:4 * d]
        c_new = f_g * c_prev + i_g * g_g
        h_new = o_g * jnp.tanh(c_new)

        # write carried state back (masked slab + direct dynamic slot store)
        hx_ref[...] = hx_masked
        cx_ref[...] = cx_masked
        hx_ref[dil] = h_new
        cx_ref[dil] = c_new

        # pooled mean over the r slots in incremental form
        gh_sc[pl.ds(row, B), :] = (hx_sum + h_new - h_prev) * inv_r
        return carry

    lax.fori_loop(0, t_chunk, step, 0, unroll=unroll)

    # ---- chunk epilogue: batched critic + L2 normalize (off serial chain) ---
    gh = gh_sc[...]                                           # (t_chunk*B, d)
    value = (jnp.sum(gh * w_critic_ref[...], axis=-1, keepdims=True)
             + b_critic_ref[...])                             # (t_chunk*B, 1)
    ss = jnp.sum(gh * gh, axis=-1, keepdims=True)
    # F.normalize(p=2, dim=1, eps=1e-12): x / max(||x||, eps) == x * rsqrt(max(ss, eps^2))
    goal = gh * lax.rsqrt(jnp.maximum(ss, 1e-24))

    # lane-dense packed output slab, written once per chunk (not per step):
    # [goal | state | value | zero pad]
    packed_ref[:, 0:d] = goal
    packed_ref[:, d:2 * d] = state_sc[...]
    packed_ref[:, 2 * d:2 * d + 1] = value
    packed_ref[:, 2 * d + 1:] = jnp.zeros(
        (t_chunk * B, pack_w - 2 * d - 1), jnp.float32)


def manager_forward_rollout(params, z_seq, hidden0, mask_seq, dil_seq,
                            *, t_chunk=None):
    """Run T Manager.forward steps in a single pallas_call.

    z_seq: (T, B, d); mask_seq: (T, B, 1); dil_seq: (T,) int32 dilation schedule.
    hidden0: (hx, cx), each slot-major (r, B, d).
    Returns goal (T,B,d), (hx, cx) slot-major final state, state (T,B,d), value (T,B,1).
    """
    T, B, d = z_seq.shape
    hx0, cx0 = hidden0
    r = hx0.shape[0]
    if t_chunk is None:
        t_chunk = T              # hold the whole sequence per grid step (tiny here)
    assert T % t_chunk == 0, "T must be divisible by t_chunk"
    num_chunks = T // t_chunk
    assert num_chunks == 1 or (t_chunk * B) % 8 == 0, \
        "chunked rollouts need t_chunk*B sublane-aligned"
    pack_w = ((2 * d + 1 + 127) // 128) * 128     # lane-dense output slab width

    # Free wrapper-side reshape so the kernel works on 2-D (rows, lanes) blocks
    # and never needs an in-kernel rank-changing reshape.
    z2 = z_seq.reshape(T * B, d)

    grid_spec = pltpu.PrefetchScalarGridSpec(
        num_scalar_prefetch=1,                    # dilation schedule -> SMEM
        grid=(num_chunks,),
        in_specs=[
            pl.BlockSpec((t_chunk * B, d), lambda c, dil: (c, 0)),       # z chunk
            pl.BlockSpec((t_chunk, B, 1), lambda c, dil: (c, 0, 0)),     # mask chunk
            pl.BlockSpec((r, B, d), lambda c, dil: (0, 0, 0)),           # hx0
            pl.BlockSpec((r, B, d), lambda c, dil: (0, 0, 0)),           # cx0
            # Weights: constant block index -> DMA'd once, resident in VMEM.
            pl.BlockSpec((d, d), lambda c, dil: (0, 0)),                 # w_space
            pl.BlockSpec((1, d), lambda c, dil: (0, 0)),                 # b_space
            pl.BlockSpec((d, 4 * d), lambda c, dil: (0, 0)),             # w_ih
            pl.BlockSpec((d, 4 * d), lambda c, dil: (0, 0)),             # w_hh
            pl.BlockSpec((1, 4 * d), lambda c, dil: (0, 0)),             # b_gates
            pl.BlockSpec((1, d), lambda c, dil: (0, 0)),                 # w_critic row
            pl.BlockSpec((1, 1), lambda c, dil: (0, 0)),                 # b_critic
        ],
        out_specs=[
            pl.BlockSpec((t_chunk * B, pack_w), lambda c, dil: (c, 0)),  # packed
            pl.BlockSpec((r, B, d), lambda c, dil: (0, 0, 0)),           # hx carry
            pl.BlockSpec((r, B, d), lambda c, dil: (0, 0, 0)),           # cx carry
        ],
        scratch_shapes=[
            pltpu.VMEM((t_chunk * B, d), jnp.float32),       # state (relu(Mspace))
            pltpu.VMEM((t_chunk * B, 4 * d), jnp.float32),   # hoisted x-gate proj
            pltpu.VMEM((t_chunk * B, d), jnp.float32),       # goal_hat per step
        ],
    )
    out_shapes = (
        jax.ShapeDtypeStruct((T * B, pack_w), jnp.float32),
        jax.ShapeDtypeStruct((r, B, d), jnp.float32),
        jax.ShapeDtypeStruct((r, B, d), jnp.float32),
    )
    kernel = functools.partial(_manager_kernel, unroll=(t_chunk <= 32))
    packed, hx_out, cx_out = pl.pallas_call(
        kernel,
        grid_spec=grid_spec,
        out_shape=out_shapes,
        # Time is a true recurrence -> "arbitrary".  (A leading "parallel" axis
        # over independent actors/rollouts is the v7x 2nd-TensorCore lever.)
        compiler_params=pltpu.CompilerParams(
            dimension_semantics=("arbitrary",)),
    )(dil_seq, z2, mask_seq, hx0, cx0,
      params["w_space"], params["b_space"],
      params["w_ih"], params["w_hh"], params["b_gates"],
      params["w_critic_row"], params["b_critic"])

    packed = packed.reshape(T, B, pack_w)
    goal = packed[:, :, 0:d]
    state = packed[:, :, d:2 * d]
    value = packed[:, :, 2 * d:2 * d + 1]
    return goal, (hx_out, cx_out), state, value


def manager_forward(params, z, hidden, mask, *, dilation):
    """Single-step forward matching the PyTorch Manager.forward signature.
    hidden is slot-major: (hx, cx) each (r, B, d).
    NOTE: prefer manager_forward_rollout in interaction loops; a T=1 call pays
    full launch + weight-DMA cost every environment step."""
    goal, hidden_out, state, value = manager_forward_rollout(
        params, z[None], hidden, mask[None], jnp.array([dilation], jnp.int32))
    return goal[0], hidden_out, state[0], value[0]


# ---------------- layout helpers (run once at the rollout boundary) ----------
def flat_to_slot_major(a, r):
    """PyTorch flat (B, d*r) with index unit*r+slot  ->  slot-major (r, B, d)."""
    B, dr = a.shape
    d = dr // r
    return jnp.transpose(a.reshape(B, d, r), (2, 0, 1))


def slot_major_to_flat(a):
    r, B, d = a.shape
    return jnp.transpose(a, (1, 2, 0)).reshape(B, d * r)


# ---------------- parameters -------------------------------------------------
def init_params(key, d):
    """Deterministic synthetic raw parameters (shapes from the module __init__),
    stored pre-transposed (in, out) so forward does x @ W."""
    ks = jax.random.split(key, 8)
    s = 1.0 / jnp.sqrt(d)
    u = lambda k, shape: jax.random.uniform(k, shape, jnp.float32, -s, s)
    return {
        "w_space": u(ks[0], (d, d)),
        "b_space": u(ks[1], (1, d)),
        "w_ih": u(ks[2], (d, 4 * d)),
        "b_ih": u(ks[3], (1, 4 * d)),
        "w_hh": u(ks[4], (d, 4 * d)),
        "b_hh": u(ks[5], (1, 4 * d)),
        "w_critic": u(ks[6], (d, 1)),
        "b_critic": u(ks[7], (1, 1)),
    }


def fuse_params(p):
    """Pre-sum the LSTM gate biases and pre-transpose the critic row once,
    outside the per-step path."""
    return {
        "w_space": p["w_space"],
        "b_space": p["b_space"],
        "w_ih": p["w_ih"],                                   # (d, 4d)
        "w_hh": p["w_hh"],                                   # (d, 4d)
        "b_gates": p["b_ih"] + p["b_hh"],                    # (1, 4d)
        "w_critic_row": p["w_critic"].T,                     # (1, d)
        "b_critic": p["b_critic"],                           # (1, 1)
    }


# ---------------- pure-JAX reference (PyTorch semantics, flat layout) --------
def manager_reference(params, z, hidden, mask, *, dilation, r):
    B, d = z.shape
    state = jnp.maximum(z @ params["w_space"] + params["b_space"], 0.0)
    hx = hidden[0] * mask
    cx = hidden[1] * mask
    d_idx = dilation + jnp.arange(0, r * d, r)
    h_prev = hx[:, d_idx]
    c_prev = cx[:, d_idx]
    gates = (state @ params["w_ih"] + params["b_ih"]
             + h_prev @ params["w_hh"] + params["b_hh"])
    i_g = jax.nn.sigmoid(gates[:, 0:d])
    f_g = jax.nn.sigmoid(gates[:, d:2 * d])
    g_g = jnp.tanh(gates[:, 2 * d:3 * d])
    o_g = jax.nn.sigmoid(gates[:, 3 * d:4 * d])
    c_new = f_g * c_prev + i_g * g_g
    h_new = o_g * jnp.tanh(c_new)
    hx = hx.at[:, d_idx].set(h_new)
    cx = cx.at[:, d_idx].set(c_new)
    goal_hat = hx.reshape(B, d, r).sum(-1) / r
    value = (jnp.sum(goal_hat * params["w_critic"][:, 0][None, :],
                     axis=-1, keepdims=True) + params["b_critic"])
    norm = jnp.sqrt(jnp.sum(goal_hat * goal_hat, axis=-1, keepdims=True))
    goal = goal_hat / jnp.maximum(norm, 1e-12)
    return goal, (hx, cx), state, value


if __name__ == "__main__":
    B, d, r, T = 2, 32, 4, 8       # batch, manager hidden dim, dilation radius, steps

    key = jax.random.PRNGKey(0)
    k_p, k_z, k_h, k_c, k_m = jax.random.split(key, 5)
    raw_params = init_params(k_p, d)
    kparams = fuse_params(raw_params)

    z_seq = jax.random.normal(k_z, (T, B, d), jnp.float32)
    hx_flat = jax.random.normal(k_h, (B, d * r), jnp.float32)
    cx_flat = jax.random.normal(k_c, (B, d * r), jnp.float32)
    mask_seq = (jax.random.uniform(k_m, (T, B, 1)) > 0.2).astype(jnp.float32)
    dil_seq = jnp.arange(T, dtype=jnp.int32) % r      # dilation advances each step

    # PyTorch flat -> slot-major once, at the boundary (not per step).
    hidden0 = (flat_to_slot_major(hx_flat, r), flat_to_slot_major(cx_flat, r))

    rollout = jax.jit(manager_forward_rollout)
    goal, (hx_n, cx_n), state, value = rollout(kparams, z_seq, hidden0,
                                               mask_seq, dil_seq)
    jax.block_until_ready((goal, hx_n, cx_n, state, value))

    # Reference: loop the pure-JAX mirror of the PyTorch semantics.
    hx_r, cx_r = hx_flat, cx_flat
    g_list, s_list, v_list = [], [], []
    for t in range(T):
        g, (hx_r, cx_r), s, v = manager_reference(
            raw_params, z_seq[t], (hx_r, cx_r), mask_seq[t],
            dilation=int(t % r), r=r)
        g_list.append(g); s_list.append(s); v_list.append(v)
    g_ref = jnp.stack(g_list)
    s_ref = jnp.stack(s_list)
    v_ref = jnp.stack(v_list)

    checks = [
        (goal, g_ref), (state, s_ref), (value, v_ref),
        (slot_major_to_flat(hx_n), hx_r), (slot_major_to_flat(cx_n), cx_r),
    ]
    for a, b in checks:
        assert jnp.allclose(a, b, atol=1e-4, rtol=1e-4), "mismatch vs reference"

    # Single-step path (module-signature forward) sanity check.
    g1, _, s1, v1 = manager_forward(kparams, z_seq[0], hidden0, mask_seq[0],
                                    dilation=0)
    jax.block_until_ready((g1, s1, v1))
    assert jnp.allclose(g1, g_ref[0], atol=1e-4, rtol=1e-4), "single-step goal mismatch"
    assert jnp.allclose(v1, v_ref[0], atol=1e-4, rtol=1e-4), "single-step value mismatch"

    print("KERNEL_OK")
</pallas_src>

<mosaic_0001>
module attributes {stable_mosaic.version = 11 : i64} {
  func.func @_manager_kernel(%arg0: i32, %arg1: memref<8xi32, #tpu.memory_space<smem>>, %arg2: memref<16x32xf32, #tpu.memory_space<vmem>>, %arg3: memref<8x2x1xf32, #tpu.memory_space<vmem>>, %arg4: memref<4x2x32xf32, #tpu.memory_space<vmem>>, %arg5: memref<4x2x32xf32, #tpu.memory_space<vmem>>, %arg6: memref<32x32xf32, #tpu.memory_space<vmem>>, %arg7: memref<1x32xf32, #tpu.memory_space<vmem>>, %arg8: memref<32x128xf32, #tpu.memory_space<vmem>>, %arg9: memref<32x128xf32, #tpu.memory_space<vmem>>, %arg10: memref<1x128xf32, #tpu.memory_space<vmem>>, %arg11: memref<1x32xf32, #tpu.memory_space<vmem>>, %arg12: memref<1x1xf32, #tpu.memory_space<vmem>>, %arg13: memref<16x128xf32, #tpu.memory_space<vmem>>, %arg14: memref<4x2x32xf32, #tpu.memory_space<vmem>>, %arg15: memref<4x2x32xf32, #tpu.memory_space<vmem>>, %arg16: memref<16x32xf32, #tpu.memory_space<vmem>>, %arg17: memref<16x128xf32, #tpu.memory_space<vmem>>, %arg18: memref<16x32xf32, #tpu.memory_space<vmem>>) attributes {dimension_semantics = [#tpu.dimension_semantics<arbitrary>], iteration_bounds = array<i64: 1>, scalar_prefetch = 1 : i64, scratch_operands = 3 : i64, tpu.core_type = #tpu.core_type<tc>, window_params = [{transform_indices = @transform_0, window_bounds = array<i64: 16, 32>}, {transform_indices = @transform_1, window_bounds = array<i64: 8, 2, 1>}, {pipeline_mode = #tpu.pipeline_mode<synchronous>, transform_indices = @transform_2, window_bounds = array<i64: 4, 2, 32>}, {pipeline_mode = #tpu.pipeline_mode<synchronous>, transform_indices = @transform_3, window_bounds = array<i64: 4, 2, 32>}, {pipeline_mode = #tpu.pipeline_mode<synchronous>, transform_indices = @transform_4, window_bounds = array<i64: 32, 32>}, {pipeline_mode = #tpu.pipeline_mode<synchronous>, transform_indices = @transform_5, window_bounds = array<i64: 1, 32>}, {pipeline_mode = #tpu.pipeline_mode<synchronous>, transform_indices = @transform_6, window_bounds = array<i64: 32, 128>}, {pipeline_mode = #tpu.pipeline_mode<synchronous>, transform_indices = @transform_7, window_bounds = array<i64: 32, 128>}, {pipeline_mode = #tpu.pipeline_mode<synchronous>, transform_indices = @transform_8, window_bounds = array<i64: 1, 128>}, {pipeline_mode = #tpu.pipeline_mode<synchronous>, transform_indices = @transform_9, window_bounds = array<i64: 1, 32>}, {pipeline_mode = #tpu.pipeline_mode<synchronous>, transform_indices = @transform_10, window_bounds = array<i64: 1, 1>}, {transform_indices = @transform_11, window_bounds = array<i64: 16, 128>}, {pipeline_mode = #tpu.pipeline_mode<synchronous>, transform_indices = @transform_12, window_bounds = array<i64: 4, 2, 32>}, {pipeline_mode = #tpu.pipeline_mode<synchronous>, transform_indices = @transform_13, window_bounds = array<i64: 4, 2, 32>}]} {
    %c0_i32 = arith.constant 0 : i32
    %0 = arith.cmpi eq, %arg0, %c0_i32 : i32
    %1 = arith.extui %0 : i1 to i32
    %c0_i32_0 = arith.constant 0 : i32
    %2 = arith.cmpi ne, %1, %c0_i32_0 : i32
    scf.if %2 {
      %c0_283 = arith.constant 0 : index
      %c0_284 = arith.constant 0 : index
      %c0_285 = arith.constant 0 : index
      %546 = vector.load %arg4[%c0_283, %c0_284, %c0_285] : memref<4x2x32xf32, #tpu.memory_space<vmem>>, vector<4x2x32xf32>
      %c0_286 = arith.constant 0 : index
      %c0_287 = arith.constant 0 : index
      %c0_288 = arith.constant 0 : index
      %547 = vector.load %arg14[%c0_286, %c0_287, %c0_288] : memref<4x2x32xf32, #tpu.memory_space<vmem>>, vector<4x2x32xf32>
      tpu.vector_store %arg14[%c0_286, %c0_287, %c0_288], %546 {strides = array<i32>} : memref<4x2x32xf32, #tpu.memory_space<vmem>>, vector<4x2x32xf32>,
      %c0_289 = arith.constant 0 : index
      %c0_290 = arith.constant 0 : index
      %c0_291 = arith.constant 0 : index
      %548 = vector.load %arg5[%c0_289, %c0_290, %c0_291] : memref<4x2x32xf32, #tpu.memory_space<vmem>>, vector<4x2x32xf32>
      %c0_292 = arith.constant 0 : index
      %c0_293 = arith.constant 0 : index
      %c0_294 = arith.constant 0 : index
      %549 = vector.load %arg15[%c0_292, %c0_293, %c0_294] : memref<4x2x32xf32, #tpu.memory_space<vmem>>, vector<4x2x32xf32>
      tpu.vector_store %arg15[%c0_292, %c0_293, %c0_294], %548 {strides = array<i32>} : memref<4x2x32xf32, #tpu.memory_space<vmem>>, vector<4x2x32xf32>,
    } else {
    }
    %c0 = arith.constant 0 : index
    %c0_1 = arith.constant 0 : index
    %3 = vector.load %arg2[%c0, %c0_1] : memref<16x32xf32, #tpu.memory_space<vmem>>, vector<16x32xf32>
    %c0_2 = arith.constant 0 : index
    %c0_3 = arith.constant 0 : index
    %4 = vector.load %arg6[%c0_2, %c0_3] : memref<32x32xf32, #tpu.memory_space<vmem>>, vector<32x32xf32>
    %cst = arith.constant dense<0.000000e+00> : vector<16x32xf32>
    %5 = tpu.matmul %3, %4, %cst {dimension_numbers = #tpu.dot_dimension_numbers<[1], [0], [0], [1], [0, 0, 1, 1], [], []>} : vector<16x32xf32>, vector<32x32xf32>, vector<16x32xf32> -> vector<16x32xf32>
    %c0_4 = arith.constant 0 : index
    %c0_5 = arith.constant 0 : index
    %6 = vector.load %arg7[%c0_4, %c0_5] : memref<1x32xf32, #tpu.memory_space<vmem>>, vector<1x32xf32>
    %7 = vector.broadcast %6 : vector<1x32xf32> to vector<16x32xf32>
    %8 = arith.addf %5, %7 : vector<16x32xf32>
    %cst_6 = arith.constant 0.000000e+00 : f32
    %9 = vector.broadcast %cst_6 : f32 to vector<16x32xf32>
    %10 = arith.maximumf %8, %9 : vector<16x32xf32>
    %c0_7 = arith.constant 0 : index
    %c0_8 = arith.constant 0 : index
    %11 = vector.load %arg16[%c0_7, %c0_8] : memref<16x32xf32, #tpu.memory_space<vmem>>, vector<16x32xf32>
    tpu.vector_store %arg16[%c0_7, %c0_8], %10 {strides = array<i32>} : memref<16x32xf32, #tpu.memory_space<vmem>>, vector<16x32xf32>,
    %c0_9 = arith.constant 0 : index
    %c0_10 = arith.constant 0 : index
    %12 = vector.load %arg8[%c0_9, %c0_10] : memref<32x128xf32, #tpu.memory_space<vmem>>, vector<32x128xf32>
    %cst_11 = arith.constant dense<0.000000e+00> : vector<16x128xf32>
    %13 = tpu.matmul %10, %12, %cst_11 {dimension_numbers = #tpu.dot_dimension_numbers<[1], [0], [0], [1], [0, 0, 1, 1], [], []>} : vector<16x32xf32>, vector<32x128xf32>, vector<16x128xf32> -> vector<16x128xf32>
    %c0_12 = arith.constant 0 : index
    %c0_13 = arith.constant 0 : index
    %14 = vector.load %arg10[%c0_12, %c0_13] : memref<1x128xf32, #tpu.memory_space<vmem>>, vector<1x128xf32>
    %15 = vector.broadcast %14 : vector<1x128xf32> to vector<16x128xf32>
    %16 = arith.addf %13, %15 : vector<16x128xf32>
    %c0_14 = arith.constant 0 : index
    %c0_15 = arith.constant 0 : index
    %17 = vector.load %arg17[%c0_14, %c0_15] : memref<16x128xf32, #tpu.memory_space<vmem>>, vector<16x128xf32>
    tpu.vector_store %arg17[%c0_14, %c0_15], %16 {strides = array<i32>} : memref<16x128xf32, #tpu.memory_space<vmem>>, vector<16x128xf32>,
    %c8_i32 = arith.constant 8 : i32
    %18 = arith.muli %arg0, %c8_i32 : i32
    %c0_i32_16 = arith.constant 0 : i32
    %19 = arith.addi %18, %c0_i32_16 : i32
    %20 = arith.index_cast %19 : i32 to index
    %21 = memref.load %arg1[%20] : memref<8xi32, #tpu.memory_space<smem>>
    %c2_i32 = arith.constant 2 : i32
    %22 = arith.muli %c0_i32_16, %c2_i32 : i32
    %23 = tpu.assume_multiple %22, 2 : i32
    %24 = arith.index_cast %c0_i32_16 : i32 to index
    %c0_17 = arith.constant 0 : index
    %c0_18 = arith.constant 0 : index
    %25 = vector.load %arg3[%24, %c0_17, %c0_18] : memref<8x2x1xf32, #tpu.memory_space<vmem>>, vector<1x2x1xf32>
    %26 = vector.shape_cast %25 : vector<1x2x1xf32> to vector<2x1xf32>
    %27 = arith.index_cast %21 : i32 to index
    %c0_19 = arith.constant 0 : index
    %c0_20 = arith.constant 0 : index
    %28 = vector.load %arg14[%27, %c0_19, %c0_20] : memref<4x2x32xf32, #tpu.memory_space<vmem>>, vector<1x2x32xf32>
    %29 = vector.shape_cast %28 : vector<1x2x32xf32> to vector<2x32xf32>
    %30 = vector.broadcast %26 : vector<2x1xf32> to vector<2x32xf32>
    %31 = arith.mulf %29, %30 : vector<2x32xf32>
    %32 = arith.index_cast %21 : i32 to index
    %c0_21 = arith.constant 0 : index
    %c0_22 = arith.constant 0 : index
    %33 = vector.load %arg15[%32, %c0_21, %c0_22] : memref<4x2x32xf32, #tpu.memory_space<vmem>>, vector<1x2x32xf32>
    %34 = vector.shape_cast %33 : vector<1x2x32xf32> to vector<2x32xf32>
    %35 = vector.broadcast %26 : vector<2x1xf32> to vector<2x32xf32>
    %36 = arith.mulf %34, %35 : vector<2x32xf32>
    %c0_23 = arith.constant 0 : index
    %c0_24 = arith.constant 0 : index
    %c0_25 = arith.constant 0 : index
    %37 = vector.load %arg14[%c0_23, %c0_24, %c0_25] : memref<4x2x32xf32, #tpu.memory_space<vmem>>, vector<4x2x32xf32>
    %38 = vector.shape_cast %26 : vector<2x1xf32> to vector<1x2x1xf32>
    %39 = vector.broadcast %38 : vector<1x2x1xf32> to vector<4x2x32xf32>
    %40 = arith.mulf %37, %39 : vector<4x2x32xf32>
    %c0_26 = arith.constant 0 : index
    %c0_27 = arith.constant 0 : index
    %c0_28 = arith.constant 0 : index
    %41 = vector.load %arg15[%c0_26, %c0_27, %c0_28] : memref<4x2x32xf32, #tpu.memory_space<vmem>>, vector<4x2x32xf32>
    %42 = vector.shape_cast %26 : vector<2x1xf32> to vector<1x2x1xf32>
    %43 = vector.broadcast %42 : vector<1x2x1xf32> to vector<4x2x32xf32>
    %44 = arith.mulf %41, %43 : vector<4x2x32xf32>
    %cst_29 = arith.constant dense<0.000000e+00> : vector<2x32xf32>
    %45 = vector.multi_reduction <add>, %40, %cst_29 [0] : vector<4x2x32xf32> to vector<2x32xf32>
    %46 = arith.index_cast %23 : i32 to index
    %c0_30 = arith.constant 0 : index
    %47 = vector.load %arg17[%46, %c0_30] : memref<16x128xf32, #tpu.memory_space<vmem>>, vector<2x128xf32>
    %c0_31 = arith.constant 0 : index
    %c0_32 = arith.constant 0 : index
    %48 = vector.load %arg9[%c0_31, %c0_32] : memref<32x128xf32, #tpu.memory_space<vmem>>, vector<32x128xf32>
    %cst_33 = arith.constant dense<0.000000e+00> : vector<2x128xf32>
    %49 = tpu.matmul %31, %48, %cst_33 {dimension_numbers = #tpu.dot_dimension_numbers<[1], [0], [0], [1], [0, 0, 1, 1], [], []>} : vector<2x32xf32>, vector<32x128xf32>, vector<2x128xf32> -> vector<2x128xf32>
    %50 = arith.addf %47, %49 : vector<2x128xf32>
    %51 = arith.negf %50 : vector<2x128xf32>
    %52 = math.exp %51 : vector<2x128xf32>
    %cst_34 = arith.constant 1.000000e+00 : f32
    %53 = vector.broadcast %cst_34 : f32 to vector<2x128xf32>
    %54 = arith.addf %53, %52 : vector<2x128xf32>
    %55 = arith.divf %53, %54 : vector<2x128xf32>
    %56 = math.tanh %50 : vector<2x128xf32>
    %57 = vector.extract_strided_slice %55 {offsets = [0, 0], sizes = [2, 32], strides = [1, 1]} : vector<2x128xf32> to vector<2x32xf32>
    %58 = vector.extract_strided_slice %55 {offsets = [0, 32], sizes = [2, 32], strides = [1, 1]} : vector<2x128xf32> to vector<2x32xf32>
    %59 = vector.extract_strided_slice %56 {offsets = [0, 64], sizes = [2, 32], strides = [1, 1]} : vector<2x128xf32> to vector<2x32xf32>
    %60 = vector.extract_strided_slice %55 {offsets = [0, 96], sizes = [2, 32], strides = [1, 1]} : vector<2x128xf32> to vector<2x32xf32>
    %61 = arith.mulf %58, %36 : vector<2x32xf32>
    %62 = arith.mulf %57, %59 : vector<2x32xf32>
    %63 = arith.addf %61, %62 : vector<2x32xf32>
    %64 = math.tanh %63 : vector<2x32xf32>
    %65 = arith.mulf %60, %64 : vector<2x32xf32>
    %c0_35 = arith.constant 0 : index
    %c0_36 = arith.constant 0 : index
    %c0_37 = arith.constant 0 : index
    %66 = vector.load %arg14[%c0_35, %c0_36, %c0_37] : memref<4x2x32xf32, #tpu.memory_space<vmem>>, vector<4x2x32xf32>
    tpu.vector_store %arg14[%c0_35, %c0_36, %c0_37], %40 {strides = array<i32>} : memref<4x2x32xf32, #tpu.memory_space<vmem>>, vector<4x2x32xf32>,
    %c0_38 = arith.constant 0 : index
    %c0_39 = arith.constant 0 : index
    %c0_40 = arith.constant 0 : index
    %67 = vector.load %arg15[%c0_38, %c0_39, %c0_40] : memref<4x2x32xf32, #tpu.memory_space<vmem>>, vector<4x2x32xf32>
    tpu.vector_store %arg15[%c0_38, %c0_39, %c0_40], %44 {strides = array<i32>} : memref<4x2x32xf32, #tpu.memory_space<vmem>>, vector<4x2x32xf32>,
    %68 = arith.index_cast %21 : i32 to index
    %c0_41 = arith.constant 0 : index
    %c0_42 = arith.constant 0 : index
    %69 = vector.load %arg14[%68, %c0_41, %c0_42] : memref<4x2x32xf32, #tpu.memory_space<vmem>>, vector<1x2x32xf32>
    %70 = vector.shape_cast %69 : vector<1x2x32xf32> to vector<2x32xf32>
    %71 = vector.shape_cast %65 : vector<2x32xf32> to vector<1x2x32xf32>
    tpu.vector_store %arg14[%68, %c0_41, %c0_42], %71 {strides = array<i32>} : memref<4x2x32xf32, #tpu.memory_space<vmem>>, vector<1x2x32xf32>,
    %72 = arith.index_cast %21 : i32 to index
    %c0_43 = arith.constant 0 : index
    %c0_44 = arith.constant 0 : index
    %73 = vector.load %arg15[%72, %c0_43, %c0_44] : memref<4x2x32xf32, #tpu.memory_space<vmem>>, vector<1x2x32xf32>
    %74 = vector.shape_cast %73 : vector<1x2x32xf32> to vector<2x32xf32>
    %75 = vector.shape_cast %63 : vector<2x32xf32> to vector<1x2x32xf32>
    tpu.vector_store %arg15[%72, %c0_43, %c0_44], %75 {strides = array<i32>} : memref<4x2x32xf32, #tpu.memory_space<vmem>>, vector<1x2x32xf32>,
    %76 = arith.addf %45, %65 : vector<2x32xf32>
    %77 = arith.subf %76, %31 : vector<2x32xf32>
    %cst_45 = arith.constant 2.500000e-01 : f32
    %78 = vector.broadcast %cst_45 : f32 to vector<2x32xf32>
    %79 = arith.mulf %77, %78 : vector<2x32xf32>
    %80 = arith.index_cast %23 : i32 to index
    %c0_46 = arith.constant 0 : index
    %81 = vector.load %arg18[%80, %c0_46] : memref<16x32xf32, #tpu.memory_space<vmem>>, vector<2x32xf32>
    tpu.vector_store %arg18[%80, %c0_46], %79 {strides = array<i32>} : memref<16x32xf32, #tpu.memory_space<vmem>>, vector<2x32xf32>,
    %c1_i32 = arith.constant 1 : i32
    %82 = arith.addi %18, %c1_i32 : i32
    %83 = arith.index_cast %82 : i32 to index
    %84 = memref.load %arg1[%83] : memref<8xi32, #tpu.memory_space<smem>>
    %c2_i32_47 = arith.constant 2 : i32
    %85 = arith.muli %c1_i32, %c2_i32_47 : i32
    %86 = tpu.assume_multiple %85, 2 : i32
    %87 = arith.index_cast %c1_i32 : i32 to index
    %c0_48 = arith.constant 0 : index
    %c0_49 = arith.constant 0 : index
    %88 = vector.load %arg3[%87, %c0_48, %c0_49] : memref<8x2x1xf32, #tpu.memory_space<vmem>>, vector<1x2x1xf32>
    %89 = vector.shape_cast %88 : vector<1x2x1xf32> to vector<2x1xf32>
    %90 = arith.index_cast %84 : i32 to index
    %c0_50 = arith.constant 0 : index
    %c0_51 = arith.constant 0 : index
    %91 = vector.load %arg14[%90, %c0_50, %c0_51] : memref<4x2x32xf32, #tpu.memory_space<vmem>>, vector<1x2x32xf32>
    %92 = vector.shape_cast %91 : vector<1x2x32xf32> to vector<2x32xf32>
    %93 = vector.broadcast %89 : vector<2x1xf32> to vector<2x32xf32>
    %94 = arith.mulf %92, %93 : vector<2x32xf32>
    %95 = arith.index_cast %84 : i32 to index
    %c0_52 = arith.constant 0 : index
    %c0_53 = arith.constant 0 : index
    %96 = vector.load %arg15[%95, %c0_52, %c0_53] : memref<4x2x32xf32, #tpu.memory_space<vmem>>, vector<1x2x32xf32>
    %97 = vector.shape_cast %96 : vector<1x2x32xf32> to vector<2x32xf32>
    %98 = vector.broadcast %89 : vector<2x1xf32> to vector<2x32xf32>
    %99 = arith.mulf %97, %98 : vector<2x32xf32>
    %c0_54 = arith.constant 0 : index
    %c0_55 = arith.constant 0 : index
    %c0_56 = arith.constant 0 : index
    %100 = vector.load %arg14[%c0_54, %c0_55, %c0_56] : memref<4x2x32xf32, #tpu.memory_space<vmem>>, vector<4x2x32xf32>
    %101 = vector.shape_cast %89 : vector<2x1xf32> to vector<1x2x1xf32>
    %102 = vector.broadcast %101 : vector<1x2x1xf32> to vector<4x2x32xf32>
    %103 = arith.mulf %100, %102 : vector<4x2x32xf32>
    %c0_57 = arith.constant 0 : index
    %c0_58 = arith.constant 0 : index
    %c0_59 = arith.constant 0 : index
    %104 = vector.load %arg15[%c0_57, %c0_58, %c0_59] : memref<4x2x32xf32, #tpu.memory_space<vmem>>, vector<4x2x32xf32>
    %105 = vector.shape_cast %89 : vector<2x1xf32> to vector<1x2x1xf32>
    %106 = vector.broadcast %105 : vector<1x2x1xf32> to vector<4x2x32xf32>
    %107 = arith.mulf %104, %106 : vector<4x2x32xf32>
    %cst_60 = arith.constant dense<0.000000e+00> : vector<2x32xf32>
    %108 = vector.multi_reduction <add>, %103, %cst_60 [0] : vector<4x2x32xf32> to vector<2x32xf32>
    %109 = arith.index_cast %86 : i32 to index
    %c0_61 = arith.constant 0 : index
    %110 = vector.load %arg17[%109, %c0_61] : memref<16x128xf32, #tpu.memory_space<vmem>>, vector<2x128xf32>
    %c0_62 = arith.constant 0 : index
    %c0_63 = arith.constant 0 : index
    %111 = vector.load %arg9[%c0_62, %c0_63] : memref<32x128xf32, #tpu.memory_space<vmem>>, vector<32x128xf32>
    %cst_64 = arith.constant dense<0.000000e+00> : vector<2x128xf32>
    %112 = tpu.matmul %94, %111, %cst_64 {dimension_numbers = #tpu.dot_dimension_numbers<[1], [0], [0], [1], [0, 0, 1, 1], [], []>} : vector<2x32xf32>, vector<32x128xf32>, vector<2x128xf32> -> vector<2x128xf32>
    %113 = arith.addf %110, %112 : vector<2x128xf32>
    %114 = arith.negf %113 : vector<2x128xf32>
    %115 = math.exp %114 : vector<2x128xf32>
    %cst_65 = arith.constant 1.000000e+00 : f32
    %116 = vector.broadcast %cst_65 : f32 to vector<2x128xf32>
    %117 = arith.addf %116, %115 : vector<2x128xf32>
    %118 = arith.divf %116, %117 : vector<2x128xf32>
    %119 = math.tanh %113 : vector<2x128xf32>
    %120 = vector.extract_strided_slice %118 {offsets = [0, 0], sizes = [2, 32], strides = [1, 1]} : vector<2x128xf32> to vector<2x32xf32>
    %121 = vector.extract_strided_slice %118 {offsets = [0, 32], sizes = [2, 32], strides = [1, 1]} : vector<2x128xf32> to vector<2x32xf32>
    %122 = vector.extract_strided_slice %119 {offsets = [0, 64], sizes = [2, 32], strides = [1, 1]} : vector<2x128xf32> to vector<2x32xf32>
    %123 = vector.extract_strided_slice %118 {offsets = [0, 96], sizes = [2, 32], strides = [1, 1]} : vector<2x128xf32> to vector<2x32xf32>
    %124 = arith.mulf %121, %99 : vector<2x32xf32>
    %125 = arith.mulf %120, %122 : vector<2x32xf32>
    %126 = arith.addf %124, %125 : vector<2x32xf32>
    %127 = math.tanh %126 : vector<2x32xf32>
    %128 = arith.mulf %123, %127 : vector<2x32xf32>
    %c0_66 = arith.constant 0 : index
    %c0_67 = arith.constant 0 : index
    %c0_68 = arith.constant 0 : index
    %129 = vector.load %arg14[%c0_66, %c0_67, %c0_68] : memref<4x2x32xf32, #tpu.memory_space<vmem>>, vector<4x2x32xf32>
    tpu.vector_store %arg14[%c0_66, %c0_67, %c0_68], %103 {strides = array<i32>} : memref<4x2x32xf32, #tpu.memory_space<vmem>>, vector<4x2x32xf32>,
    %c0_69 = arith.constant 0 : index
    %c0_70 = arith.constant 0 : index
    %c0_71 = arith.constant 0 : index
    %130 = vector.load %arg15[%c0_69, %c0_70, %c0_71] : memref<4x2x32xf32, #tpu.memory_space<vmem>>, vector<4x2x32xf32>
    tpu.vector_store %arg15[%c0_69, %c0_70, %c0_71], %107 {strides = array<i32>} : memref<4x2x32xf32, #tpu.memory_space<vmem>>, vector<4x2x32xf32>,
    %131 = arith.index_cast %84 : i32 to index
    %c0_72 = arith.constant 0 : index
    %c0_73 = arith.constant 0 : index
    %132 = vector.load %arg14[%131, %c0_72, %c0_73] : memref<4x2x32xf32, #tpu.memory_space<vmem>>, vector<1x2x32xf32>
    %133 = vector.shape_cast %132 : vector<1x2x32xf32> to vector<2x32xf32>
    %134 = vector.shape_cast %128 : vector<2x32xf32> to vector<1x2x32xf32>
    tpu.vector_store %arg14[%131, %c0_72, %c0_73], %134 {strides = array<i32>} : memref<4x2x32xf32, #tpu.memory_space<vmem>>, vector<1x2x32xf32>,
    %135 = arith.index_cast %84 : i32 to index
    %c0_74 = arith.constant 0 : index
    %c0_75 = arith.constant 0 : index
    %136 = vector.load %arg15[%135, %c0_74, %c0_75] : memref<4x2x32xf32, #tpu.memory_space<vmem>>, vector<1x2x32xf32>
    %137 = vector.shape_cast %136 : vector<1x2x32xf32> to vector<2x32xf32>
    %138 = vector.shape_cast %126 : vector<2x32xf32> to vector<1x2x32xf32>
    tpu.vector_store %arg15[%135, %c0_74, %c0_75], %138 {strides = array<i32>} : memref<4x2x32xf32, #tpu.memory_space<vmem>>, vector<1x2x32xf32>,
    %139 = arith.addf %108, %128 : vector<2x32xf32>
    %140 = arith.subf %139, %94 : vector<2x32xf32>
    %cst_76 = arith.constant 2.500000e-01 : f32
    %141 = vector.broadcast %cst_76 : f32 to vector<2x32xf32>
    %142 = arith.mulf %140, %141 : vector<2x32xf32>
    %143 = arith.index_cast %86 : i32 to index
    %c0_77 = arith.constant 0 : index
    %144 = vector.load %arg18[%143, %c0_77] : memref<16x32xf32, #tpu.memory_space<vmem>>, vector<2x32xf32>
    tpu.vector_store %arg18[%143, %c0_77], %142 {strides = array<i32>} : memref<16x32xf32, #tpu.memory_space<vmem>>, vector<2x32xf32>,
    %c2_i32_78 = arith.constant 2 : i32
    %145 = arith.addi %18, %c2_i32_78 : i32
    %146 = arith.index_cast %145 : i32 to index
    %147 = memref.load %arg1[%146] : memref<8xi32, #tpu.memory_space<smem>>
    %c2_i32_79 = arith.constant 2 : i32
    %148 = arith.muli %c2_i32_78, %c2_i32_79 : i32
    %149 = tpu.assume_multiple %148, 2 : i32
    %150 = arith.index_cast %c2_i32_78 : i32 to index
    %c0_80 = arith.constant 0 : index
    %c0_81 = arith.constant 0 : index
    %151 = vector.load %arg3[%150, %c0_80, %c0_81] : memref<8x2x1xf32, #tpu.memory_space<vmem>>, vector<1x2x1xf32>
    %152 = vector.shape_cast %151 : vector<1x2x1xf32> to vector<2x1xf32>
    %153 = arith.index_cast %147 : i32 to index
    %c0_82 = arith.constant 0 : index
    %c0_83 = arith.constant 0 : index
    %154 = vector.load %arg14[%153, %c0_82, %c0_83] : memref<4x2x32xf32, #tpu.memory_space<vmem>>, vector<1x2x32xf32>
    %155 = vector.shape_cast %154 : vector<1x2x32xf32> to vector<2x32xf32>
    %156 = vector.broadcast %152 : vector<2x1xf32> to vector<2x32xf32>
    %157 = arith.mulf %155, %156 : vector<2x32xf32>
    %158 = arith.index_cast %147 : i32 to index
    %c0_84 = arith.constant 0 : index
    %c0_85 = arith.constant 0 : index
    %159 = vector.load %arg15[%158, %c0_84, %c0_85] : memref<4x2x32xf32, #tpu.memory_space<vmem>>, vector<1x2x32xf32>
    %160 = vector.shape_cast %159 : vector<1x2x32xf32> to vector<2x32xf32>
    %161 = vector.broadcast %152 : vector<2x1xf32> to vector<2x32xf32>
    %162 = arith.mulf %160, %161 : vector<2x32xf32>
    %c0_86 = arith.constant 0 : index
    %c0_87 = arith.constant 0 : index
    %c0_88 = arith.constant 0 : index
    %163 = vector.load %arg14[%c0_86, %c0_87, %c0_88] : memref<4x2x32xf32, #tpu.memory_space<vmem>>, vector<4x2x32xf32>
    %164 = vector.shape_cast %152 : vector<2x1xf32> to vector<1x2x1xf32>
    %165 = vector.broadcast %164 : vector<1x2x1xf32> to vector<4x2x32xf32>
    %166 = arith.mulf %163, %165 : vector<4x2x32xf32>
    %c0_89 = arith.constant 0 : index
    %c0_90 = arith.constant 0 : index
    %c0_91 = arith.constant 0 : index
    %167 = vector.load %arg15[%c0_89, %c0_90, %c0_91] : memref<4x2x32xf32, #tpu.memory_space<vmem>>, vector<4x2x32xf32>
    %168 = vector.shape_cast %152 : vector<2x1xf32> to vector<1x2x1xf32>
    %169 = vector.broadcast %168 : vector<1x2x1xf32> to vector<4x2x32xf32>
    %170 = arith.mulf %167, %169 : vector<4x2x32xf32>
    %cst_92 = arith.constant dense<0.000000e+00> : vector<2x32xf32>
    %171 = vector.multi_reduction <add>, %166, %cst_92 [0] : vector<4x2x32xf32> to vector<2x32xf32>
    %172 = arith.index_cast %149 : i32 to index
    %c0_93 = arith.constant 0 : index
    %173 = vector.load %arg17[%172, %c0_93] : memref<16x128xf32, #tpu.memory_space<vmem>>, vector<2x128xf32>
    %c0_94 = arith.constant 0 : index
    %c0_95 = arith.constant 0 : index
    %174 = vector.load %arg9[%c0_94, %c0_95] : memref<32x128xf32, #tpu.memory_space<vmem>>, vector<32x128xf32>
    %cst_96 = arith.constant dense<0.000000e+00> : vector<2x128xf32>
    %175 = tpu.matmul %157, %174, %cst_96 {dimension_numbers = #tpu.dot_dimension_numbers<[1], [0], [0], [1], [0, 0, 1, 1], [], []>} : vector<2x32xf32>, vector<32x128xf32>, vector<2x128xf32> -> vector<2x128xf32>
    %176 = arith.addf %173, %175 : vector<2x128xf32>
    %177 = arith.negf %176 : vector<2x128xf32>
    %178 = math.exp %177 : vector<2x128xf32>
    %cst_97 = arith.constant 1.000000e+00 : f32
    %179 = vector.broadcast %cst_97 : f32 to vector<2x128xf32>
    %180 = arith.addf %179, %178 : vector<2x128xf32>
    %181 = arith.divf %179, %180 : vector<2x128xf32>
    %182 = math.tanh %176 : vector<2x128xf32>
    %183 = vector.extract_strided_slice %181 {offsets = [0, 0], sizes = [2, 32], strides = [1, 1]} : vector<2x128xf32> to vector<2x32xf32>
    %184 = vector.extract_strided_slice %181 {offsets = [0, 32], sizes = [2, 32], strides = [1, 1]} : vector<2x128xf32> to vector<2x32xf32>
    %185 = vector.extract_strided_slice %182 {offsets = [0, 64], sizes = [2, 32], strides = [1, 1]} : vector<2x128xf32> to vector<2x32xf32>
    %186 = vector.extract_strided_slice %181 {offsets = [0, 96], sizes = [2, 32], strides = [1, 1]} : vector<2x128xf32> to vector<2x32xf32>
    %187 = arith.mulf %184, %162 : vector<2x32xf32>
    %188 = arith.mulf %183, %185 : vector<2x32xf32>
    %189 = arith.addf %187, %188 : vector<2x32xf32>
    %190 = math.tanh %189 : vector<2x32xf32>
    %191 = arith.mulf %186, %190 : vector<2x32xf32>
    %c0_98 = arith.constant 0 : index
    %c0_99 = arith.constant 0 : index
    %c0_100 = arith.constant 0 : index
    %192 = vector.load %arg14[%c0_98, %c0_99, %c0_100] : memref<4x2x32xf32, #tpu.memory_space<vmem>>, vector<4x2x32xf32>
    tpu.vector_store %arg14[%c0_98, %c0_99, %c0_100], %166 {strides = array<i32>} : memref<4x2x32xf32, #tpu.memory_space<vmem>>, vector<4x2x32xf32>,
    %c0_101 = arith.constant 0 : index
    %c0_102 = arith.constant 0 : index
    %c0_103 = arith.constant 0 : index
    %193 = vector.load %arg15[%c0_101, %c0_102, %c0_103] : memref<4x2x32xf32, #tpu.memory_space<vmem>>, vector<4x2x32xf32>
    tpu.vector_store %arg15[%c0_101, %c0_102, %c0_103], %170 {strides = array<i32>} : memref<4x2x32xf32, #tpu.memory_space<vmem>>, vector<4x2x32xf32>,
    %194 = arith.index_cast %147 : i32 to index
    %c0_104 = arith.constant 0 : index
    %c0_105 = arith.constant 0 : index
    %195 = vector.load %arg14[%194, %c0_104, %c0_105] : memref<4x2x32xf32, #tpu.memory_space<vmem>>, vector<1x2x32xf32>
    %196 = vector.shape_cast %195 : vector<1x2x32xf32> to vector<2x32xf32>
    %197 = vector.shape_cast %191 : vector<2x32xf32> to vector<1x2x32xf32>
    tpu.vector_store %arg14[%194, %c0_104, %c0_105], %197 {strides = array<i32>} : memref<4x2x32xf32, #tpu.memory_space<vmem>>, vector<1x2x32xf32>,
    %198 = arith.index_cast %147 : i32 to index
    %c0_106 = arith.constant 0 : index
    %c0_107 = arith.constant 0 : index
    %199 = vector.load %arg15[%198, %c0_106, %c0_107] : memref<4x2x32xf32, #tpu.memory_space<vmem>>, vector<1x2x32xf32>
    %200 = vector.shape_cast %199 : vector<1x2x32xf32> to vector<2x32xf32>
    %201 = vector.shape_cast %189 : vector<2x32xf32> to vector<1x2x32xf32>
    tpu.vector_store %arg15[%198, %c0_106, %c0_107], %201 {strides = array<i32>} : memref<4x2x32xf32, #tpu.memory_space<vmem>>, vector<1x2x32xf32>,
    %202 = arith.addf %171, %191 : vector<2x32xf32>
    %203 = arith.subf %202, %157 : vector<2x32xf32>
    %cst_108 = arith.constant 2.500000e-01 : f32
    %204 = vector.broadcast %cst_108 : f32 to vector<2x32xf32>
    %205 = arith.mulf %203, %204 : vector<2x32xf32>
    %206 = arith.index_cast %149 : i32 to index
    %c0_109 = arith.constant 0 : index
    %207 = vector.load %arg18[%206, %c0_109] : memref<16x32xf32, #tpu.memory_space<vmem>>, vector<2x32xf32>
    tpu.vector_store %arg18[%206, %c0_109], %205 {strides = array<i32>} : memref<16x32xf32, #tpu.memory_space<vmem>>, vector<2x32xf32>,
    %c3_i32 = arith.constant 3 : i32
    %208 = arith.addi %18, %c3_i32 : i32
    %209 = arith.index_cast %208 : i32 to index
    %210 = memref.load %arg1[%209] : memref<8xi32, #tpu.memory_space<smem>>
    %c2_i32_110 = arith.constant 2 : i32
    %211 = arith.muli %c3_i32, %c2_i32_110 : i32
    %212 = tpu.assume_multiple %211, 2 : i32
    %213 = arith.index_cast %c3_i32 : i32 to index
    %c0_111 = arith.constant 0 : index
    %c0_112 = arith.constant 0 : index
    %214 = vector.load %arg3[%213, %c0_111, %c0_112] : memref<8x2x1xf32, #tpu.memory_space<vmem>>, vector<1x2x1xf32>
    %215 = vector.shape_cast %214 : vector<1x2x1xf32> to vector<2x1xf32>
    %216 = arith.index_cast %210 : i32 to index
    %c0_113 = arith.constant 0 : index
    %c0_114 = arith.constant 0 : index
    %217 = vector.load %arg14[%216, %c0_113, %c0_114] : memref<4x2x32xf32, #tpu.memory_space<vmem>>, vector<1x2x32xf32>
    %218 = vector.shape_cast %217 : vector<1x2x32xf32> to vector<2x32xf32>
    %219 = vector.broadcast %215 : vector<2x1xf32> to vector<2x32xf32>
    %220 = arith.mulf %218, %219 : vector<2x32xf32>
    %221 = arith.index_cast %210 : i32 to index
    %c0_115 = arith.constant 0 : index
    %c0_116 = arith.constant 0 : index
    %222 = vector.load %arg15[%221, %c0_115, %c0_116] : memref<4x2x32xf32, #tpu.memory_space<vmem>>, vector<1x2x32xf32>
    %223 = vector.shape_cast %222 : vector<1x2x32xf32> to vector<2x32xf32>
    %224 = vector.broadcast %215 : vector<2x1xf32> to vector<2x32xf32>
    %225 = arith.mulf %223, %224 : vector<2x32xf32>
    %c0_117 = arith.constant 0 : index
    %c0_118 = arith.constant 0 : index
    %c0_119 = arith.constant 0 : index
    %226 = vector.load %arg14[%c0_117, %c0_118, %c0_119] : memref<4x2x32xf32, #tpu.memory_space<vmem>>, vector<4x2x32xf32>
    %227 = vector.shape_cast %215 : vector<2x1xf32> to vector<1x2x1xf32>
    %228 = vector.broadcast %227 : vector<1x2x1xf32> to vector<4x2x32xf32>
    %229 = arith.mulf %226, %228 : vector<4x2x32xf32>
    %c0_120 = arith.constant 0 : index
    %c0_121 = arith.constant 0 : index
    %c0_122 = arith.constant 0 : index
    %230 = vector.load %arg15[%c0_120, %c0_121, %c0_122] : memref<4x2x32xf32, #tpu.memory_space<vmem>>, vector<4x2x32xf32>
    %231 = vector.shape_cast %215 : vector<2x1xf32> to vector<1x2x1xf32>
    %232 = vector.broadcast %231 : vector<1x2x1xf32> to vector<4x2x32xf32>
    %233 = arith.mulf %230, %232 : vector<4x2x32xf32>
    %cst_123 = arith.constant dense<0.000000e+00> : vector<2x32xf32>
    %234 = vector.multi_reduction <add>, %229, %cst_123 [0] : vector<4x2x32xf32> to vector<2x32xf32>
    %235 = arith.index_cast %212 : i32 to index
    %c0_124 = arith.constant 0 : index
    %236 = vector.load %arg17[%235, %c0_124] : memref<16x128xf32, #tpu.memory_space<vmem>>, vector<2x128xf32>
    %c0_125 = arith.constant 0 : index
    %c0_126 = arith.constant 0 : index
    %237 = vector.load %arg9[%c0_125, %c0_126] : memref<32x128xf32, #tpu.memory_space<vmem>>, vector<32x128xf32>
    %cst_127 = arith.constant dense<0.000000e+00> : vector<2x128xf32>
    %238 = tpu.matmul %220, %237, %cst_127 {dimension_numbers = #tpu.dot_dimension_numbers<[1], [0], [0], [1], [0, 0, 1, 1], [], []>} : vector<2x32xf32>, vector<32x128xf32>, vector<2x128xf32> -> vector<2x128xf32>
    %239 = arith.addf %236, %238 : vector<2x128xf32>
    %240 = arith.negf %239 : vector<2x128xf32>
    %241 = math.exp %240 : vector<2x128xf32>
    %cst_128 = arith.constant 1.000000e+00 : f32
    %242 = vector.broadcast %cst_128 : f32 to vector<2x128xf32>
    %243 = arith.addf %242, %241 : vector<2x128xf32>
    %244 = arith.divf %242, %243 : vector<2x128xf32>
    %245 = math.tanh %239 : vector<2x128xf32>
    %246 = vector.extract_strided_slice %244 {offsets = [0, 0], sizes = [2, 32], strides = [1, 1]} : vector<2x128xf32> to vector<2x32xf32>
    %247 = vector.extract_strided_slice %244 {offsets = [0, 32], sizes = [2, 32], strides = [1, 1]} : vector<2x128xf32> to vector<2x32xf32>
    %248 = vector.extract_strided_slice %245 {offsets = [0, 64], sizes = [2, 32], strides = [1, 1]} : vector<2x128xf32> to vector<2x32xf32>
    %249 = vector.extract_strided_slice %244 {offsets = [0, 96], sizes = [2, 32], strides = [1, 1]} : vector<2x128xf32> to vector<2x32xf32>
    %250 = arith.mulf %247, %225 : vector<2x32xf32>
    %251 = arith.mulf %246, %248 : vector<2x32xf32>
    %252 = arith.addf %250, %251 : vector<2x32xf32>
    %253 = math.tanh %252 : vector<2x32xf32>
    %254 = arith.mulf %249, %253 : vector<2x32xf32>
    %c0_129 = arith.constant 0 : index
    %c0_130 = arith.constant 0 : index
    %c0_131 = arith.constant 0 : index
    %255 = vector.load %arg14[%c0_129, %c0_130, %c0_131] : memref<4x2x32xf32, #tpu.memory_space<vmem>>, vector<4x2x32xf32>
    tpu.vector_store %arg14[%c0_129, %c0_130, %c0_131], %229 {strides = array<i32>} : memref<4x2x32xf32, #tpu.memory_space<vmem>>, vector<4x2x32xf32>,
    %c0_132 = arith.constant 0 : index
    %c0_133 = arith.constant 0 : index
    %c0_134 = arith.constant 0 : index
    %256 = vector.load %arg15[%c0_132, %c0_133, %c0_134] : memref<4x2x32xf32, #tpu.memory_space<vmem>>, vector<4x2x32xf32>
    tpu.vector_store %arg15[%c0_132, %c0_133, %c0_134], %233 {strides = array<i32>} : memref<4x2x32xf32, #tpu.memory_space<vmem>>, vector<4x2x32xf32>,
    %257 = arith.index_cast %210 : i32 to index
    %c0_135 = arith.constant 0 : index
    %c0_136 = arith.constant 0 : index
    %258 = vector.load %arg14[%257, %c0_135, %c0_136] : memref<4x2x32xf32, #tpu.memory_space<vmem>>, vector<1x2x32xf32>
    %259 = vector.shape_cast %258 : vector<1x2x32xf32> to vector<2x32xf32>
    %260 = vector.shape_cast %254 : vector<2x32xf32> to vector<1x2x32xf32>
    tpu.vector_store %arg14[%257, %c0_135, %c0_136], %260 {strides = array<i32>} : memref<4x2x32xf32, #tpu.memory_space<vmem>>, vector<1x2x32xf32>,
    %261 = arith.index_cast %210 : i32 to index
    %c0_137 = arith.constant 0 : index
    %c0_138 = arith.constant 0 : index
    %262 = vector.load %arg15[%261, %c0_137, %c0_138] : memref<4x2x32xf32, #tpu.memory_space<vmem>>, vector<1x2x32xf32>
    %263 = vector.shape_cast %262 : vector<1x2x32xf32> to vector<2x32xf32>
    %264 = vector.shape_cast %252 : vector<2x32xf32> to vector<1x2x32xf32>
    tpu.vector_store %arg15[%261, %c0_137, %c0_138], %264 {strides = array<i32>} : memref<4x2x32xf32, #tpu.memory_space<vmem>>, vector<1x2x32xf32>,
    %265 = arith.addf %234, %254 : vector<2x32xf32>
    %266 = arith.subf %265, %220 : vector<2x32xf32>
    %cst_139 = arith.constant 2.500000e-01 : f32
    %267 = vector.broadcast %cst_139 : f32 to vector<2x32xf32>
    %268 = arith.mulf %266, %267 : vector<2x32xf32>
    %269 = arith.index_cast %212 : i32 to index
    %c0_140 = arith.constant 0 : index
    %270 = vector.load %arg18[%269, %c0_140] : memref<16x32xf32, #tpu.memory_space<vmem>>, vector<2x32xf32>
    tpu.vector_store %arg18[%269, %c0_140], %268 {strides = array<i32>} : memref<16x32xf32, #tpu.memory_space<vmem>>, vector<2x32xf32>,
    %c4_i32 = arith.constant 4 : i32
    %271 = arith.addi %18, %c4_i32 : i32
    %272 = arith.index_cast %271 : i32 to index
    %273 = memref.load %arg1[%272] : memref<8xi32, #tpu.memory_space<smem>>
    %c2_i32_141 = arith.constant 2 : i32
    %274 = arith.muli %c4_i32, %c2_i32_141 : i32
    %275 = tpu.assume_multiple %274, 2 : i32
    %276 = arith.index_cast %c4_i32 : i32 to index
    %c0_142 = arith.constant 0 : index
    %c0_143 = arith.constant 0 : index
    %277 = vector.load %arg3[%276, %c0_142, %c0_143] : memref<8x2x1xf32, #tpu.memory_space<vmem>>, vector<1x2x1xf32>
    %278 = vector.shape_cast %277 : vector<1x2x1xf32> to vector<2x1xf32>
    %279 = arith.index_cast %273 : i32 to index
    %c0_144 = arith.constant 0 : index
    %c0_145 = arith.constant 0 : index
    %280 = vector.load %arg14[%279, %c0_144, %c0_145] : memref<4x2x32xf32, #tpu.memory_space<vmem>>, vector<1x2x32xf32>
    %281 = vector.shape_cast %280 : vector<1x2x32xf32> to vector<2x32xf32>
    %282 = vector.broadcast %278 : vector<2x1xf32> to vector<2x32xf32>
    %283 = arith.mulf %281, %282 : vector<2x32xf32>
    %284 = arith.index_cast %273 : i32 to index
    %c0_146 = arith.constant 0 : index
    %c0_147 = arith.constant 0 : index
    %285 = vector.load %arg15[%284, %c0_146, %c0_147] : memref<4x2x32xf32, #tpu.memory_space<vmem>>, vector<1x2x32xf32>
    %286 = vector.shape_cast %285 : vector<1x2x32xf32> to vector<2x32xf32>
    %287 = vector.broadcast %278 : vector<2x1xf32> to vector<2x32xf32>
    %288 = arith.mulf %286, %287 : vector<2x32xf32>
    %c0_148 = arith.constant 0 : index
    %c0_149 = arith.constant 0 : index
    %c0_150 = arith.constant 0 : index
    %289 = vector.load %arg14[%c0_148, %c0_149, %c0_150] : memref<4x2x32xf32, #tpu.memory_space<vmem>>, vector<4x2x32xf32>
    %290 = vector.shape_cast %278 : vector<2x1xf32> to vector<1x2x1xf32>
    %291 = vector.broadcast %290 : vector<1x2x1xf32> to vector<4x2x32xf32>
    %292 = arith.mulf %289, %291 : vector<4x2x32xf32>
    %c0_151 = arith.constant 0 : index
    %c0_152 = arith.constant 0 : index
    %c0_153 = arith.constant 0 : index
    %293 = vector.load %arg15[%c0_151, %c0_152, %c0_153] : memref<4x2x32xf32, #tpu.memory_space<vmem>>, vector<4x2x32xf32>
    %294 = vector.shape_cast %278 : vector<2x1xf32> to vector<1x2x1xf32>
    %295 = vector.broadcast %294 : vector<1x2x1xf32> to vector<4x2x32xf32>
    %296 = arith.mulf %293, %295 : vector<4x2x32xf32>
    %cst_154 = arith.constant dense<0.000000e+00> : vector<2x32xf32>
    %297 = vector.multi_reduction <add>, %292, %cst_154 [0] : vector<4x2x32xf32> to vector<2x32xf32>
    %298 = arith.index_cast %275 : i32 to index
    %c0_155 = arith.constant 0 : index
    %299 = vector.load %arg17[%298, %c0_155] : memref<16x128xf32, #tpu.memory_space<vmem>>, vector<2x128xf32>
    %c0_156 = arith.constant 0 : index
    %c0_157 = arith.constant 0 : index
    %300 = vector.load %arg9[%c0_156, %c0_157] : memref<32x128xf32, #tpu.memory_space<vmem>>, vector<32x128xf32>
    %cst_158 = arith.constant dense<0.000000e+00> : vector<2x128xf32>
    %301 = tpu.matmul %283, %300, %cst_158 {dimension_numbers = #tpu.dot_dimension_numbers<[1], [0], [0], [1], [0, 0, 1, 1], [], []>} : vector<2x32xf32>, vector<32x128xf32>, vector<2x128xf32> -> vector<2x128xf32>
    %302 = arith.addf %299, %301 : vector<2x128xf32>
    %303 = arith.negf %302 : vector<2x128xf32>
    %304 = math.exp %303 : vector<2x128xf32>
    %cst_159 = arith.constant 1.000000e+00 : f32
    %305 = vector.broadcast %cst_159 : f32 to vector<2x128xf32>
    %306 = arith.addf %305, %304 : vector<2x128xf32>
    %307 = arith.divf %305, %306 : vector<2x128xf32>
    %308 = math.tanh %302 : vector<2x128xf32>
    %309 = vector.extract_strided_slice %307 {offsets = [0, 0], sizes = [2, 32], strides = [1, 1]} : vector<2x128xf32> to vector<2x32xf32>
    %310 = vector.extract_strided_slice %307 {offsets = [0, 32], sizes = [2, 32], strides = [1, 1]} : vector<2x128xf32> to vector<2x32xf32>
    %311 = vector.extract_strided_slice %308 {offsets = [0, 64], sizes = [2, 32], strides = [1, 1]} : vector<2x128xf32> to vector<2x32xf32>
    %312 = vector.extract_strided_slice %307 {offsets = [0, 96], sizes = [2, 32], strides = [1, 1]} : vector<2x128xf32> to vector<2x32xf32>
    %313 = arith.mulf %310, %288 : vector<2x32xf32>
    %314 = arith.mulf %309, %311 : vector<2x32xf32>
    %315 = arith.addf %313, %314 : vector<2x32xf32>
    %316 = math.tanh %315 : vector<2x32xf32>
    %317 = arith.mulf %312, %316 : vector<2x32xf32>
    %c0_160 = arith.constant 0 : index
    %c0_161 = arith.constant 0 : index
    %c0_162 = arith.constant 0 : index
    %318 = vector.load %arg14[%c0_160, %c0_161, %c0_162] : memref<4x2x32xf32, #tpu.memory_space<vmem>>, vector<4x2x32xf32>
    tpu.vector_store %arg14[%c0_160, %c0_161, %c0_162], %292 {strides = array<i32>} : memref<4x2x32xf32, #tpu.memory_space<vmem>>, vector<4x2x32xf32>,
    %c0_163 = arith.constant 0 : index
    %c0_164 = arith.constant 0 : index
    %c0_165 = arith.constant 0 : index
    %319 = vector.load %arg15[%c0_163, %c0_164, %c0_165] : memref<4x2x32xf32, #tpu.memory_space<vmem>>, vector<4x2x32xf32>
    tpu.vector_store %arg15[%c0_163, %c0_164, %c0_165], %296 {strides = array<i32>} : memref<4x2x32xf32, #tpu.memory_space<vmem>>, vector<4x2x32xf32>,
    %320 = arith.index_cast %273 : i32 to index
    %c0_166 = arith.constant 0 : index
    %c0_167 = arith.constant 0 : index
    %321 = vector.load %arg14[%320, %c0_166, %c0_167] : memref<4x2x32xf32, #tpu.memory_space<vmem>>, vector<1x2x32xf32>
    %322 = vector.shape_cast %321 : vector<1x2x32xf32> to vector<2x32xf32>
    %323 = vector.shape_cast %317 : vector<2x32xf32> to vector<1x2x32xf32>
    tpu.vector_store %arg14[%320, %c0_166, %c0_167], %323 {strides = array<i32>} : memref<4x2x32xf32, #tpu.memory_space<vmem>>, vector<1x2x32xf32>,
    %324 = arith.index_cast %273 : i32 to index
    %c0_168 = arith.constant 0 : index
    %c0_169 = arith.constant 0 : index
    %325 = vector.load %arg15[%324, %c0_168, %c0_169] : memref<4x2x32xf32, #tpu.memory_space<vmem>>, vector<1x2x32xf32>
    %326 = vector.shape_cast %325 : vector<1x2x32xf32> to vector<2x32xf32>
    %327 = vector.shape_cast %315 : vector<2x32xf32> to vector<1x2x32xf32>
    tpu.vector_store %arg15[%324, %c0_168, %c0_169], %327 {strides = array<i32>} : memref<4x2x32xf32, #tpu.memory_space<vmem>>, vector<1x2x32xf32>,
    %328 = arith.addf %297, %317 : vector<2x32xf32>
    %329 = arith.subf %328, %283 : vector<2x32xf32>
    %cst_170 = arith.constant 2.500000e-01 : f32
    %330 = vector.broadcast %cst_170 : f32 to vector<2x32xf32>
    %331 = arith.mulf %329, %330 : vector<2x32xf32>
    %332 = arith.index_cast %275 : i32 to index
    %c0_171 = arith.constant 0 : index
    %333 = vector.load %arg18[%332, %c0_171] : memref<16x32xf32, #tpu.memory_space<vmem>>, vector<2x32xf32>
    tpu.vector_store %arg18[%332, %c0_171], %331 {strides = array<i32>} : memref<16x32xf32, #tpu.memory_space<vmem>>, vector<2x32xf32>,
    %c5_i32 = arith.constant 5 : i32
    %334 = arith.addi %18, %c5_i32 : i32
    %335 = arith.index_cast %334 : i32 to index
    %336 = memref.load %arg1[%335] : memref<8xi32, #tpu.memory_space<smem>>
    %c2_i32_172 = arith.constant 2 : i32
    %337 = arith.muli %c5_i32, %c2_i32_172 : i32
    %338 = tpu.assume_multiple %337, 2 : i32
    %339 = arith.index_cast %c5_i32 : i32 to index
    %c0_173 = arith.constant 0 : index
    %c0_174 = arith.constant 0 : index
    %340 = vector.load %arg3[%339, %c0_173, %c0_174] : memref<8x2x1xf32, #tpu.memory_space<vmem>>, vector<1x2x1xf32>
    %341 = vector.shape_cast %340 : vector<1x2x1xf32> to vector<2x1xf32>
    %342 = arith.index_cast %336 : i32 to index
    %c0_175 = arith.constant 0 : index
    %c0_176 = arith.constant 0 : index
    %343 = vector.load %arg14[%342, %c0_175, %c0_176] : memref<4x2x32xf32, #tpu.memory_space<vmem>>, vector<1x2x32xf32>
    %344 = vector.shape_cast %343 : vector<1x2x32xf32> to vector<2x32xf32>
    %345 = vector.broadcast %341 : vector<2x1xf32> to vector<2x32xf32>
    %346 = arith.mulf %344, %345 : vector<2x32xf32>
    %347 = arith.index_cast %336 : i32 to index
    %c0_177 = arith.constant 0 : index
    %c0_178 = arith.constant 0 : index
    %348 = vector.load %arg15[%347, %c0_177, %c0_178] : memref<4x2x32xf32, #tpu.memory_space<vmem>>, vector<1x2x32xf32>
    %349 = vector.shape_cast %348 : vector<1x2x32xf32> to vector<2x32xf32>
    %350 = vector.broadcast %341 : vector<2x1xf32> to vector<2x32xf32>
    %351 = arith.mulf %349, %350 : vector<2x32xf32>
    %c0_179 = arith.constant 0 : index
    %c0_180 = arith.constant 0 : index
    %c0_181 = arith.constant 0 : index
    %352 = vector.load %arg14[%c0_179, %c0_180, %c0_181] : memref<4x2x32xf32, #tpu.memory_space<vmem>>, vector<4x2x32xf32>
    %353 = vector.shape_cast %341 : vector<2x1xf32> to vector<1x2x1xf32>
    %354 = vector.broadcast %353 : vector<1x2x1xf32> to vector<4x2x32xf32>
    %355 = arith.mulf %352, %354 : vector<4x2x32xf32>
    %c0_182 = arith.constant 0 : index
    %c0_183 = arith.constant 0 : index
    %c0_184 = arith.constant 0 : index
    %356 = vector.load %arg15[%c0_182, %c0_183, %c0_184] : memref<4x2x32xf32, #tpu.memory_space<vmem>>, vector<4x2x32xf32>
    %357 = vector.shape_cast %341 : vector<2x1xf32> to vector<1x2x1xf32>
    %358 = vector.broadcast %357 : vector<1x2x1xf32> to vector<4x2x32xf32>
    %359 = arith.mulf %356, %358 : vector<4x2x32xf32>
    %cst_185 = arith.constant dense<0.000000e+00> : vector<2x32xf32>
    %360 = vector.multi_reduction <add>, %355, %cst_185 [0] : vector<4x2x32xf32> to vector<2x32xf32>
    %361 = arith.index_cast %338 : i32 to index
    %c0_186 = arith.constant 0 : index
    %362 = vector.load %arg17[%361, %c0_186] : memref<16x128xf32, #tpu.memory_space<vmem>>, vector<2x128xf32>
    %c0_187 = arith.constant 0 : index
    %c0_188 = arith.constant 0 : index
    %363 = vector.load %arg9[%c0_187, %c0_188] : memref<32x128xf32, #tpu.memory_space<vmem>>, vector<32x128xf32>
    %cst_189 = arith.constant dense<0.000000e+00> : vector<2x128xf32>
    %364 = tpu.matmul %346, %363, %cst_189 {dimension_numbers = #tpu.dot_dimension_numbers<[1], [0], [0], [1], [0, 0, 1, 1], [], []>} : vector<2x32xf32>, vector<32x128xf32>, vector<2x128xf32> -> vector<2x128xf32>
    %365 = arith.addf %362, %364 : vector<2x128xf32>
    %366 = arith.negf %365 : vector<2x128xf32>
    %367 = math.exp %366 : vector<2x128xf32>
    %cst_190 = arith.constant 1.000000e+00 : f32
    %368 = vector.broadcast %cst_190 : f32 to vector<2x128xf32>
    %369 = arith.addf %368, %367 : vector<2x128xf32>
    %370 = arith.divf %368, %369 : vector<2x128xf32>
    %371 = math.tanh %365 : vector<2x128xf32>
    %372 = vector.extract_strided_slice %370 {offsets = [0, 0], sizes = [2, 32], strides = [1, 1]} : vector<2x128xf32> to vector<2x32xf32>
    %373 = vector.extract_strided_slice %370 {offsets = [0, 32], sizes = [2, 32], strides = [1, 1]} : vector<2x128xf32> to vector<2x32xf32>
    %374 = vector.extract_strided_slice %371 {offsets = [0, 64], sizes = [2, 32], strides = [1, 1]} : vector<2x128xf32> to vector<2x32xf32>
    %375 = vector.extract_strided_slice %370 {offsets = [0, 96], sizes = [2, 32], strides = [1, 1]} : vector<2x128xf32> to vector<2x32xf32>
    %376 = arith.mulf %373, %351 : vector<2x32xf32>
    %377 = arith.mulf %372, %374 : vector<2x32xf32>
    %378 = arith.addf %376, %377 : vector<2x32xf32>
    %379 = math.tanh %378 : vector<2x32xf32>
    %380 = arith.mulf %375, %379 : vector<2x32xf32>
    %c0_191 = arith.constant 0 : index
    %c0_192 = arith.constant 0 : index
    %c0_193 = arith.constant 0 : index
    %381 = vector.load %arg14[%c0_191, %c0_192, %c0_193] : memref<4x2x32xf32, #tpu.memory_space<vmem>>, vector<4x2x32xf32>
    tpu.vector_store %arg14[%c0_191, %c0_192, %c0_193], %355 {strides = array<i32>} : memref<4x2x32xf32, #tpu.memory_space<vmem>>, vector<4x2x32xf32>,
    %c0_194 = arith.constant 0 : index
    %c0_195 = arith.constant 0 : index
    %c0_196 = arith.constant 0 : index
    %382 = vector.load %arg15[%c0_194, %c0_195, %c0_196] : memref<4x2x32xf32, #tpu.memory_space<vmem>>, vector<4x2x32xf32>
    tpu.vector_store %arg15[%c0_194, %c0_195, %c0_196], %359 {strides = array<i32>} : memref<4x2x32xf32, #tpu.memory_space<vmem>>, vector<4x2x32xf32>,
    %383 = arith.index_cast %336 : i32 to index
    %c0_197 = arith.constant 0 : index
    %c0_198 = arith.constant 0 : index
    %384 = vector.load %arg14[%383, %c0_197, %c0_198] : memref<4x2x32xf32, #tpu.memory_space<vmem>>, vector<1x2x32xf32>
    %385 = vector.shape_cast %384 : vector<1x2x32xf32> to vector<2x32xf32>
    %386 = vector.shape_cast %380 : vector<2x32xf32> to vector<1x2x32xf32>
    tpu.vector_store %arg14[%383, %c0_197, %c0_198], %386 {strides = array<i32>} : memref<4x2x32xf32, #tpu.memory_space<vmem>>, vector<1x2x32xf32>,
    %387 = arith.index_cast %336 : i32 to index
    %c0_199 = arith.constant 0 : index
    %c0_200 = arith.constant 0 : index
    %388 = vector.load %arg15[%387, %c0_199, %c0_200] : memref<4x2x32xf32, #tpu.memory_space<vmem>>, vector<1x2x32xf32>
    %389 = vector.shape_cast %388 : vector<1x2x32xf32> to vector<2x32xf32>
    %390 = vector.shape_cast %378 : vector<2x32xf32> to vector<1x2x32xf32>
    tpu.vector_store %arg15[%387, %c0_199, %c0_200], %390 {strides = array<i32>} : memref<4x2x32xf32, #tpu.memory_space<vmem>>, vector<1x2x32xf32>,
    %391 = arith.addf %360, %380 : vector<2x32xf32>
    %392 = arith.subf %391, %346 : vector<2x32xf32>
    %cst_201 = arith.constant 2.500000e-01 : f32
    %393 = vector.broadcast %cst_201 : f32 to vector<2x32xf32>
    %394 = arith.mulf %392, %393 : vector<2x32xf32>
    %395 = arith.index_cast %338 : i32 to index
    %c0_202 = arith.constant 0 : index
    %396 = vector.load %arg18[%395, %c0_202] : memref<16x32xf32, #tpu.memory_space<vmem>>, vector<2x32xf32>
    tpu.vector_store %arg18[%395, %c0_202], %394 {strides = array<i32>} : memref<16x32xf32, #tpu.memory_space<vmem>>, vector<2x32xf32>,
    %c6_i32 = arith.constant 6 : i32
    %397 = arith.addi %18, %c6_i32 : i32
    %398 = arith.index_cast %397 : i32 to index
    %399 = memref.load %arg1[%398] : memref<8xi32, #tpu.memory_space<smem>>
    %c2_i32_203 = arith.constant 2 : i32
    %400 = arith.muli %c6_i32, %c2_i32_203 : i32
    %401 = tpu.assume_multiple %400, 2 : i32
    %402 = arith.index_cast %c6_i32 : i32 to index
    %c0_204 = arith.constant 0 : index
    %c0_205 = arith.constant 0 : index
    %403 = vector.load %arg3[%402, %c0_204, %c0_205] : memref<8x2x1xf32, #tpu.memory_space<vmem>>, vector<1x2x1xf32>
    %404 = vector.shape_cast %403 : vector<1x2x1xf32> to vector<2x1xf32>
    %405 = arith.index_cast %399 : i32 to index
    %c0_206 = arith.constant 0 : index
    %c0_207 = arith.constant 0 : index
    %406 = vector.load %arg14[%405, %c0_206, %c0_207] : memref<4x2x32xf32, #tpu.memory_space<vmem>>, vector<1x2x32xf32>
    %407 = vector.shape_cast %406 : vector<1x2x32xf32> to vector<2x32xf32>
    %408 = vector.broadcast %404 : vector<2x1xf32> to vector<2x32xf32>
    %409 = arith.mulf %407, %408 : vector<2x32xf32>
    %410 = arith.index_cast %399 : i32 to index
    %c0_208 = arith.constant 0 : index
    %c0_209 = arith.constant 0 : index
    %411 = vector.load %arg15[%410, %c0_208, %c0_209] : memref<4x2x32xf32, #tpu.memory_space<vmem>>, vector<1x2x32xf32>
    %412 = vector.shape_cast %411 : vector<1x2x32xf32> to vector<2x32xf32>
    %413 = vector.broadcast %404 : vector<2x1xf32> to vector<2x32xf32>
    %414 = arith.mulf %412, %413 : vector<2x32xf32>
    %c0_210 = arith.constant 0 : index
    %c0_211 = arith.constant 0 : index
    %c0_212 = arith.constant 0 : index
    %415 = vector.load %arg14[%c0_210, %c0_211, %c0_212] : memref<4x2x32xf32, #tpu.memory_space<vmem>>, vector<4x2x32xf32>
    %416 = vector.shape_cast %404 : vector<2x1xf32> to vector<1x2x1xf32>
    %417 = vector.broadcast %416 : vector<1x2x1xf32> to vector<4x2x32xf32>
    %418 = arith.mulf %415, %417 : vector<4x2x32xf32>
    %c0_213 = arith.constant 0 : index
    %c0_214 = arith.constant 0 : index
    %c0_215 = arith.constant 0 : index
    %419 = vector.load %arg15[%c0_213, %c0_214, %c0_215] : memref<4x2x32xf32, #tpu.memory_space<vmem>>, vector<4x2x32xf32>
    %420 = vector.shape_cast %404 : vector<2x1xf32> to vector<1x2x1xf32>
    %421 = vector.broadcast %420 : vector<1x2x1xf32> to vector<4x2x32xf32>
    %422 = arith.mulf %419, %421 : vector<4x2x32xf32>
    %cst_216 = arith.constant dense<0.000000e+00> : vector<2x32xf32>
    %423 = vector.multi_reduction <add>, %418, %cst_216 [0] : vector<4x2x32xf32> to vector<2x32xf32>
    %424 = arith.index_cast %401 : i32 to index
    %c0_217 = arith.constant 0 : index
    %425 = vector.load %arg17[%424, %c0_217] : memref<16x128xf32, #tpu.memory_space<vmem>>, vector<2x128xf32>
    %c0_218 = arith.constant 0 : index
    %c0_219 = arith.constant 0 : index
    %426 = vector.load %arg9[%c0_218, %c0_219] : memref<32x128xf32, #tpu.memory_space<vmem>>, vector<32x128xf32>
    %cst_220 = arith.constant dense<0.000000e+00> : vector<2x128xf32>
    %427 = tpu.matmul %409, %426, %cst_220 {dimension_numbers = #tpu.dot_dimension_numbers<[1], [0], [0], [1], [0, 0, 1, 1], [], []>} : vector<2x32xf32>, vector<32x128xf32>, vector<2x128xf32> -> vector<2x128xf32>
    %428 = arith.addf %425, %427 : vector<2x128xf32>
    %429 = arith.negf %428 : vector<2x128xf32>
    %430 = math.exp %429 : vector<2x128xf32>
    %cst_221 = arith.constant 1.000000e+00 : f32
    %431 = vector.broadcast %cst_221 : f32 to vector<2x128xf32>
    %432 = arith.addf %431, %430 : vector<2x128xf32>
    %433 = arith.divf %431, %432 : vector<2x128xf32>
    %434 = math.tanh %428 : vector<2x128xf32>
    %435 = vector.extract_strided_slice %433 {offsets = [0, 0], sizes = [2, 32], strides = [1, 1]} : vector<2x128xf32> to vector<2x32xf32>
    %436 = vector.extract_strided_slice %433 {offsets = [0, 32], sizes = [2, 32], strides = [1, 1]} : vector<2x128xf32> to vector<2x32xf32>
    %437 = vector.extract_strided_slice %434 {offsets = [0, 64], sizes = [2, 32], strides = [1, 1]} : vector<2x128xf32> to vector<2x32xf32>
    %438 = vector.extract_strided_slice %433 {offsets = [0, 96], sizes = [2, 32], strides = [1, 1]} : vector<2x128xf32> to vector<2x32xf32>
    %439 = arith.mulf %436, %414 : vector<2x32xf32>
    %440 = arith.mulf %435, %437 : vector<2x32xf32>
    %441 = arith.addf %439, %440 : vector<2x32xf32>
    %442 = math.tanh %441 : vector<2x32xf32>
    %443 = arith.mulf %438, %442 : vector<2x32xf32>
    %c0_222 = arith.constant 0 : index
    %c0_223 = arith.constant 0 : index
    %c0_224 = arith.constant 0 : index
    %444 = vector.load %arg14[%c0_222, %c0_223, %c0_224] : memref<4x2x32xf32, #tpu.memory_space<vmem>>, vector<4x2x32xf32>
    tpu.vector_store %arg14[%c0_222, %c0_223, %c0_224], %418 {strides = array<i32>} : memref<4x2x32xf32, #tpu.memory_space<vmem>>, vector<4x2x32xf32>,
    %c0_225 = arith.constant 0 : index
    %c0_226 = arith.constant 0 : index
    %c0_227 = arith.constant 0 : index
    %445 = vector.load %arg15[%c0_225, %c0_226, %c0_227] : memref<4x2x32xf32, #tpu.memory_space<vmem>>, vector<4x2x32xf32>
    tpu.vector_store %arg15[%c0_225, %c0_226, %c0_227], %422 {strides = array<i32>} : memref<4x2x32xf32, #tpu.memory_space<vmem>>, vector<4x2x32xf32>,
    %446 = arith.index_cast %399 : i32 to index
    %c0_228 = arith.constant 0 : index
    %c0_229 = arith.constant 0 : index
    %447 = vector.load %arg14[%446, %c0_228, %c0_229] : memref<4x2x32xf32, #tpu.memory_space<vmem>>, vector<1x2x32xf32>
    %448 = vector.shape_cast %447 : vector<1x2x32xf32> to vector<2x32xf32>
    %449 = vector.shape_cast %443 : vector<2x32xf32> to vector<1x2x32xf32>
    tpu.vector_store %arg14[%446, %c0_228, %c0_229], %449 {strides = array<i32>} : memref<4x2x32xf32, #tpu.memory_space<vmem>>, vector<1x2x32xf32>,
    %450 = arith.index_cast %399 : i32 to index
    %c0_230 = arith.constant 0 : index
    %c0_231 = arith.constant 0 : index
    %451 = vector.load %arg15[%450, %c0_230, %c0_231] : memref<4x2x32xf32, #tpu.memory_space<vmem>>, vector<1x2x32xf32>
    %452 = vector.shape_cast %451 : vector<1x2x32xf32> to vector<2x32xf32>
    %453 = vector.shape_cast %441 : vector<2x32xf32> to vector<1x2x32xf32>
    tpu.vector_store %arg15[%450, %c0_230, %c0_231], %453 {strides = array<i32>} : memref<4x2x32xf32, #tpu.memory_space<vmem>>, vector<1x2x32xf32>,
    %454 = arith.addf %423, %443 : vector<2x32xf32>
    %455 = arith.subf %454, %409 : vector<2x32xf32>
    %cst_232 = arith.constant 2.500000e-01 : f32
    %456 = vector.broadcast %cst_232 : f32 to vector<2x32xf32>
    %457 = arith.mulf %455, %456 : vector<2x32xf32>
    %458 = arith.index_cast %401 : i32 to index
    %c0_233 = arith.constant 0 : index
    %459 = vector.load %arg18[%458, %c0_233] : memref<16x32xf32, #tpu.memory_space<vmem>>, vector<2x32xf32>
    tpu.vector_store %arg18[%458, %c0_233], %457 {strides = array<i32>} : memref<16x32xf32, #tpu.memory_space<vmem>>, vector<2x32xf32>,
    %c7_i32 = arith.constant 7 : i32
    %460 = arith.addi %18, %c7_i32 : i32
    %461 = arith.index_cast %460 : i32 to index
    %462 = memref.load %arg1[%461] : memref<8xi32, #tpu.memory_space<smem>>
    %c2_i32_234 = arith.constant 2 : i32
    %463 = arith.muli %c7_i32, %c2_i32_234 : i32
    %464 = tpu.assume_multiple %463, 2 : i32
    %465 = arith.index_cast %c7_i32 : i32 to index
    %c0_235 = arith.constant 0 : index
    %c0_236 = arith.constant 0 : index
    %466 = vector.load %arg3[%465, %c0_235, %c0_236] : memref<8x2x1xf32, #tpu.memory_space<vmem>>, vector<1x2x1xf32>
    %467 = vector.shape_cast %466 : vector<1x2x1xf32> to vector<2x1xf32>
    %468 = arith.index_cast %462 : i32 to index
    %c0_237 = arith.constant 0 : index
    %c0_238 = arith.constant 0 : index
    %469 = vector.load %arg14[%468, %c0_237, %c0_238] : memref<4x2x32xf32, #tpu.memory_space<vmem>>, vector<1x2x32xf32>
    %470 = vector.shape_cast %469 : vector<1x2x32xf32> to vector<2x32xf32>
    %471 = vector.broadcast %467 : vector<2x1xf32> to vector<2x32xf32>
    %472 = arith.mulf %470, %471 : vector<2x32xf32>
    %473 = arith.index_cast %462 : i32 to index
    %c0_239 = arith.constant 0 : index
    %c0_240 = arith.constant 0 : index
    %474 = vector.load %arg15[%473, %c0_239, %c0_240] : memref<4x2x32xf32, #tpu.memory_space<vmem>>, vector<1x2x32xf32>
    %475 = vector.shape_cast %474 : vector<1x2x32xf32> to vector<2x32xf32>
    %476 = vector.broadcast %467 : vector<2x1xf32> to vector<2x32xf32>
    %477 = arith.mulf %475, %476 : vector<2x32xf32>
    %c0_241 = arith.constant 0 : index
    %c0_242 = arith.constant 0 : index
    %c0_243 = arith.constant 0 : index
    %478 = vector.load %arg14[%c0_241, %c0_242, %c0_243] : memref<4x2x32xf32, #tpu.memory_space<vmem>>, vector<4x2x32xf32>
    %479 = vector.shape_cast %467 : vector<2x1xf32> to vector<1x2x1xf32>
    %480 = vector.broadcast %479 : vector<1x2x1xf32> to vector<4x2x32xf32>
    %481 = arith.mulf %478, %480 : vector<4x2x32xf32>
    %c0_244 = arith.constant 0 : index
    %c0_245 = arith.constant 0 : index
    %c0_246 = arith.constant 0 : index
    %482 = vector.load %arg15[%c0_244, %c0_245, %c0_246] : memref<4x2x32xf32, #tpu.memory_space<vmem>>, vector<4x2x32xf32>
    %483 = vector.shape_cast %467 : vector<2x1xf32> to vector<1x2x1xf32>
    %484 = vector.broadcast %483 : vector<1x2x1xf32> to vector<4x2x32xf32>
    %485 = arith.mulf %482, %484 : vector<4x2x32xf32>
    %cst_247 = arith.constant dense<0.000000e+00> : vector<2x32xf32>
    %486 = vector.multi_reduction <add>, %481, %cst_247 [0] : vector<4x2x32xf32> to vector<2x32xf32>
    %487 = arith.index_cast %464 : i32 to index
    %c0_248 = arith.constant 0 : index
    %488 = vector.load %arg17[%487, %c0_248] : memref<16x128xf32, #tpu.memory_space<vmem>>, vector<2x128xf32>
    %c0_249 = arith.constant 0 : index
    %c0_250 = arith.constant 0 : index
    %489 = vector.load %arg9[%c0_249, %c0_250] : memref<32x128xf32, #tpu.memory_space<vmem>>, vector<32x128xf32>
    %cst_251 = arith.constant dense<0.000000e+00> : vector<2x128xf32>
    %490 = tpu.matmul %472, %489, %cst_251 {dimension_numbers = #tpu.dot_dimension_numbers<[1], [0], [0], [1], [0, 0, 1, 1], [], []>} : vector<2x32xf32>, vector<32x128xf32>, vector<2x128xf32> -> vector<2x128xf32>
    %491 = arith.addf %488, %490 : vector<2x128xf32>
    %492 = arith.negf %491 : vector<2x128xf32>
    %493 = math.exp %492 : vector<2x128xf32>
    %cst_252 = arith.constant 1.000000e+00 : f32
    %494 = vector.broadcast %cst_252 : f32 to vector<2x128xf32>
    %495 = arith.addf %494, %493 : vector<2x128xf32>
    %496 = arith.divf %494, %495 : vector<2x128xf32>
    %497 = math.tanh %491 : vector<2x128xf32>
    %498 = vector.extract_strided_slice %496 {offsets = [0, 0], sizes = [2, 32], strides = [1, 1]} : vector<2x128xf32> to vector<2x32xf32>
    %499 = vector.extract_strided_slice %496 {offsets = [0, 32], sizes = [2, 32], strides = [1, 1]} : vector<2x128xf32> to vector<2x32xf32>
    %500 = vector.extract_strided_slice %497 {offsets = [0, 64], sizes = [2, 32], strides = [1, 1]} : vector<2x128xf32> to vector<2x32xf32>
    %501 = vector.extract_strided_slice %496 {offsets = [0, 96], sizes = [2, 32], strides = [1, 1]} : vector<2x128xf32> to vector<2x32xf32>
    %502 = arith.mulf %499, %477 : vector<2x32xf32>
    %503 = arith.mulf %498, %500 : vector<2x32xf32>
    %504 = arith.addf %502, %503 : vector<2x32xf32>
    %505 = math.tanh %504 : vector<2x32xf32>
    %506 = arith.mulf %501, %505 : vector<2x32xf32>
    %c0_253 = arith.constant 0 : index
    %c0_254 = arith.constant 0 : index
    %c0_255 = arith.constant 0 : index
    %507 = vector.load %arg14[%c0_253, %c0_254, %c0_255] : memref<4x2x32xf32, #tpu.memory_space<vmem>>, vector<4x2x32xf32>
    tpu.vector_store %arg14[%c0_253, %c0_254, %c0_255], %481 {strides = array<i32>} : memref<4x2x32xf32, #tpu.memory_space<vmem>>, vector<4x2x32xf32>,
    %c0_256 = arith.constant 0 : index
    %c0_257 = arith.constant 0 : index
    %c0_258 = arith.constant 0 : index
    %508 = vector.load %arg15[%c0_256, %c0_257, %c0_258] : memref<4x2x32xf32, #tpu.memory_space<vmem>>, vector<4x2x32xf32>
    tpu.vector_store %arg15[%c0_256, %c0_257, %c0_258], %485 {strides = array<i32>} : memref<4x2x32xf32, #tpu.memory_space<vmem>>, vector<4x2x32xf32>,
    %509 = arith.index_cast %462 : i32 to index
    %c0_259 = arith.constant 0 : index
    %c0_260 = arith.constant 0 : index
    %510 = vector.load %arg14[%509, %c0_259, %c0_260] : memref<4x2x32xf32, #tpu.memory_space<vmem>>, vector<1x2x32xf32>
    %511 = vector.shape_cast %510 : vector<1x2x32xf32> to vector<2x32xf32>
    %512 = vector.shape_cast %506 : vector<2x32xf32> to vector<1x2x32xf32>
    tpu.vector_store %arg14[%509, %c0_259, %c0_260], %512 {strides = array<i32>} : memref<4x2x32xf32, #tpu.memory_space<vmem>>, vector<1x2x32xf32>,
    %513 = arith.index_cast %462 : i32 to index
    %c0_261 = arith.constant 0 : index
    %c0_262 = arith.constant 0 : index
    %514 = vector.load %arg15[%513, %c0_261, %c0_262] : memref<4x2x32xf32, #tpu.memory_space<vmem>>, vector<1x2x32xf32>
    %515 = vector.shape_cast %514 : vector<1x2x32xf32> to vector<2x32xf32>
    %516 = vector.shape_cast %504 : vector<2x32xf32> to vector<1x2x32xf32>
    tpu.vector_store %arg15[%513, %c0_261, %c0_262], %516 {strides = array<i32>} : memref<4x2x32xf32, #tpu.memory_space<vmem>>, vector<1x2x32xf32>,
    %517 = arith.addf %486, %506 : vector<2x32xf32>
    %518 = arith.subf %517, %472 : vector<2x32xf32>
    %cst_263 = arith.constant 2.500000e-01 : f32
    %519 = vector.broadcast %cst_263 : f32 to vector<2x32xf32>
    %520 = arith.mulf %518, %519 : vector<2x32xf32>
    %521 = arith.index_cast %464 : i32 to index
    %c0_264 = arith.constant 0 : index
    %522 = vector.load %arg18[%521, %c0_264] : memref<16x32xf32, #tpu.memory_space<vmem>>, vector<2x32xf32>
    tpu.vector_store %arg18[%521, %c0_264], %520 {strides = array<i32>} : memref<16x32xf32, #tpu.memory_space<vmem>>, vector<2x32xf32>,
    %c8_i32_265 = arith.constant 8 : i32
    %c0_266 = arith.constant 0 : index
    %c0_267 = arith.constant 0 : index
    %523 = vector.load %arg18[%c0_266, %c0_267] : memref<16x32xf32, #tpu.memory_space<vmem>>, vector<16x32xf32>
    %c0_268 = arith.constant 0 : index
    %c0_269 = arith.constant 0 : index
    %524 = vector.load %arg11[%c0_268, %c0_269] : memref<1x32xf32, #tpu.memory_space<vmem>>, vector<1x32xf32>
    %525 = vector.broadcast %524 : vector<1x32xf32> to vector<16x32xf32>
    %526 = arith.mulf %523, %525 : vector<16x32xf32>
    %cst_270 = arith.constant dense<0.000000e+00> : vector<16xf32>
    %527 = vector.multi_reduction <add>, %526, %cst_270 [1] : vector<16x32xf32> to vector<16xf32>
    %528 = vector.shape_cast %527 : vector<16xf32> to vector<16x1xf32>
    %c0_271 = arith.constant 0 : index
    %c0_272 = arith.constant 0 : index
    %529 = vector.load %arg12[%c0_271, %c0_272] : memref<1x1xf32, #tpu.memory_space<vmem>>, vector<1x1xf32>
    %530 = vector.broadcast %529 : vector<1x1xf32> to vector<16x1xf32>
    %531 = arith.addf %528, %530 : vector<16x1xf32>
    %532 = arith.mulf %523, %523 : vector<16x32xf32>
    %cst_273 = arith.constant dense<0.000000e+00> : vector<16xf32>
    %533 = vector.multi_reduction <add>, %532, %cst_273 [1] : vector<16x32xf32> to vector<16xf32>
    %534 = vector.shape_cast %533 : vector<16xf32> to vector<16x1xf32>
    %cst_274 = arith.constant 1.000000e-24 : f32
    %535 = vector.broadcast %cst_274 : f32 to vector<16x1xf32>
    %536 = arith.maximumf %534, %535 : vector<16x1xf32>
    %537 = math.rsqrt %536 : vector<16x1xf32>
    %538 = vector.broadcast %537 : vector<16x1xf32> to vector<16x32xf32>
    %539 = arith.mulf %523, %538 : vector<16x32xf32>
    %c0_275 = arith.constant 0 : index
    %c0_276 = arith.constant 0 : index
    %540 = vector.load %arg13[%c0_275, %c0_276] : memref<16x128xf32, #tpu.memory_space<vmem>>, vector<16x32xf32>
    tpu.vector_store %arg13[%c0_275, %c0_276], %539 {strides = array<i32>} : memref<16x128xf32, #tpu.memory_space<vmem>>, vector<16x32xf32>,
    %c0_277 = arith.constant 0 : index
    %c0_278 = arith.constant 0 : index
    %541 = vector.load %arg16[%c0_277, %c0_278] : memref<16x32xf32, #tpu.memory_space<vmem>>, vector<16x32xf32>
    %c0_279 = arith.constant 0 : index
    %c32 = arith.constant 32 : index
    %542 = vector.load %arg13[%c0_279, %c32] : memref<16x128xf32, #tpu.memory_space<vmem>>, vector<16x32xf32>
    tpu.vector_store %arg13[%c0_279, %c32], %541 {strides = array<i32>} : memref<16x128xf32, #tpu.memory_space<vmem>>, vector<16x32xf32>,
    %c0_280 = arith.constant 0 : index
    %c64 = arith.constant 64 : index
    %543 = vector.load %arg13[%c0_280, %c64] : memref<16x128xf32, #tpu.memory_space<vmem>>, vector<16x1xf32>
    tpu.vector_store %arg13[%c0_280, %c64], %531 {strides = array<i32>} : memref<16x128xf32, #tpu.memory_space<vmem>>, vector<16x1xf32>,
    %cst_281 = arith.constant 0.000000e+00 : f32
    %544 = vector.broadcast %cst_281 : f32 to vector<16x63xf32>
    %c0_282 = arith.constant 0 : index
    %c65 = arith.constant 65 : index
    %545 = vector.load %arg13[%c0_282, %c65] : memref<16x128xf32, #tpu.memory_space<vmem>>, vector<16x63xf32>
    tpu.vector_store %arg13[%c0_282, %c65], %544 {strides = array<i32>} : memref<16x128xf32, #tpu.memory_space<vmem>>, vector<16x63xf32>,
    return
  }
  func.func @transform_0(%arg0: i32, %arg1: memref<8xi32, #tpu.memory_space<smem>>) -> (i32, i32) {
    %c0_i32 = arith.constant 0 : i32
    %c0_i32_0 = arith.constant 0 : i32
    return %arg0, %c0_i32 : i32, i32
  }
  func.func @transform_1(%arg0: i32, %arg1: memref<8xi32, #tpu.memory_space<smem>>) -> (i32, i32, i32) {
    %c0_i32 = arith.constant 0 : i32
    %c0_i32_0 = arith.constant 0 : i32
    %c0_i32_1 = arith.constant 0 : i32
    return %arg0, %c0_i32, %c0_i32_0 : i32, i32, i32
  }
  func.func @transform_2(%arg0: i32, %arg1: memref<8xi32, #tpu.memory_space<smem>>) -> (i32, i32, i32) {
    %c0_i32 = arith.constant 0 : i32
    %c0_i32_0 = arith.constant 0 : i32
    %c0_i32_1 = arith.constant 0 : i32
    %c0_i32_2 = arith.constant 0 : i32
    return %c0_i32, %c0_i32_0, %c0_i32_1 : i32, i32, i32
  }
  func.func @transform_3(%arg0: i32, %arg1: memref<8xi32, #tpu.memory_space<smem>>) -> (i32, i32, i32) {
    %c0_i32 = arith.constant 0 : i32
    %c0_i32_0 = arith.constant 0 : i32
    %c0_i32_1 = arith.constant 0 : i32
    %c0_i32_2 = arith.constant 0 : i32
    return %c0_i32, %c0_i32_0, %c0_i32_1 : i32, i32, i32
  }
  func.func @transform_4(%arg0: i32, %arg1: memref<8xi32, #tpu.memory_space<smem>>) -> (i32, i32) {
    %c0_i32 = arith.constant 0 : i32
    %c0_i32_0 = arith.constant 0 : i32
    %c0_i32_1 = arith.constant 0 : i32
    return %c0_i32, %c0_i32_0 : i32, i32
  }
  func.func @transform_5(%arg0: i32, %arg1: memref<8xi32, #tpu.memory_space<smem>>) -> (i32, i32) {
    %c0_i32 = arith.constant 0 : i32
    %c0_i32_0 = arith.constant 0 : i32
    %c0_i32_1 = arith.constant 0 : i32
    return %c0_i32, %c0_i32_0 : i32, i32
  }
  func.func @transform_6(%arg0: i32, %arg1: memref<8xi32, #tpu.memory_space<smem>>) -> (i32, i32) {
    %c0_i32 = arith.constant 0 : i32
    %c0_i32_0 = arith.constant 0 : i32
    %c0_i32_1 = arith.constant 0 : i32
    return %c0_i32, %c0_i32_0 : i32, i32
  }
  func.func @transform_7(%arg0: i32, %arg1: memref<8xi32, #tpu.memory_space<smem>>) -> (i32, i32) {
    %c0_i32 = arith.constant 0 : i32
    %c0_i32_0 = arith.constant 0 : i32
    %c0_i32_1 = arith.constant 0 : i32
    return %c0_i32, %c0_i32_0 : i32, i32
  }
  func.func @transform_8(%arg0: i32, %arg1: memref<8xi32, #tpu.memory_space<smem>>) -> (i32, i32) {
    %c0_i32 = arith.constant 0 : i32
    %c0_i32_0 = arith.constant 0 : i32
    %c0_i32_1 = arith.constant 0 : i32
    return %c0_i32, %c0_i32_0 : i32, i32
  }
  func.func @transform_9(%arg0: i32, %arg1: memref<8xi32, #tpu.memory_space<smem>>) -> (i32, i32) {
    %c0_i32 = arith.constant 0 : i32
    %c0_i32_0 = arith.constant 0 : i32
    %c0_i32_1 = arith.constant 0 : i32
    return %c0_i32, %c0_i32_0 : i32, i32
  }
  func.func @transform_10(%arg0: i32, %arg1: memref<8xi32, #tpu.memory_space<smem>>) -> (i32, i32) {
    %c0_i32 = arith.constant 0 : i32
    %c0_i32_0 = arith.constant 0 : i32
    %c0_i32_1 = arith.constant 0 : i32
    return %c0_i32, %c0_i32_0 : i32, i32
  }
  func.func @transform_11(%arg0: i32, %arg1: memref<8xi32, #tpu.memory_space<smem>>) -> (i32, i32) {
    %c0_i32 = arith.constant 0 : i32
    %c0_i32_0 = arith.constant 0 : i32
    return %arg0, %c0_i32 : i32, i32
  }
  func.func @transform_12(%arg0: i32, %arg1: memref<8xi32, #tpu.memory_space<smem>>) -> (i32, i32, i32) {
    %c0_i32 = arith.constant 0 : i32
    %c0_i32_0 = arith.constant 0 : i32
    %c0_i32_1 = arith.constant 0 : i32
    %c0_i32_2 = arith.constant 0 : i32
    return %c0_i32, %c0_i32_0, %c0_i32_1 : i32, i32, i32
  }
  func.func @transform_13(%arg0: i32, %arg1: memref<8xi32, #tpu.memory_space<smem>>) -> (i32, i32, i32) {
    %c0_i32 = arith.constant 0 : i32
    %c0_i32_0 = arith.constant 0 : i32
    %c0_i32_1 = arith.constant 0 : i32
    %c0_i32_2 = arith.constant 0 : i32
    return %c0_i32, %c0_i32_0, %c0_i32_1 : i32, i32, i32
  }
}

</mosaic_0001>

<bundles_post_ra>
// kernel: manager_forward_rollout.1
= control target key start
LH: loop header
LB: loop body
LE: loop exit
PB: predicated region body
PF: predicated region fallthrough
CT: control target
= control target key end

     0   :  { %s2943_s0 = inlined_call_operand.vmem [shape: s32[8], index: 0, kind: input, shape index: {}]   ;;  %s2944_s1 = inlined_call_operand.vmem [shape: f32[16,32], index: 1, kind: input, shape index: {}]   ;;  %s2945_s2 = inlined_call_operand.vmem [shape: f32[8,2,1], index: 2, kind: input, shape index: {}]   ;;  %s2946_s3 = inlined_call_operand.vmem [shape: f32[4,2,32], index: 3, kind: input, shape index: {}]   ;;  %s2947_s4 = inlined_call_operand.vmem [shape: f32[4,2,32], index: 4, kind: input, shape index: {}]   ;;  %s2948_s5 = inlined_call_operand.hbm [shape: f32[32,32], index: 5, kind: input, shape index: {}]   ;;  %s2949_s6 = inlined_call_operand.hbm [shape: f32[1,32], index: 6, kind: input, shape index: {}]   ;;  %s2950_s7 = inlined_call_operand.hbm [shape: f32[32,128], index: 7, kind: input, shape index: {}]   ;;  %s2951_s8 = inlined_call_operand.hbm [shape: f32[32,128], index: 8, kind: input, shape index: {}]   ;;  %s2952_s9 = inlined_call_operand.hbm [shape: f32[1,128], index: 9, kind: input, shape index: {}]   ;;  %s2953_s10 = inlined_call_operand.hbm [shape: f32[1,32], index: 10, kind: input, shape index: {}]   ;;  %s2954_s12 = inlined_call_operand.vmem [shape: f32[16,128], index: 12, kind: output, shape index: {0}]   ;;  %s2955_s13 = inlined_call_operand.hbm [shape: f32[4,2,32], index: 13, kind: output, shape index: {1}]   ;;  %s2956_s14 = inlined_call_operand.hbm [shape: f32[4,2,32], index: 14, kind: output, shape index: {2}]   ;;  %s2957_s11 = inlined_call_operand.<no memory space> [shape: f32[1,1], index: 11, kind: input, shape index: {}]  }
   0x1   :  { %s20_s15 = sshll.u32 %s2943_s0, 4  ;;  %v24_v0 = vstv %s2957_s11  ;;  %s21_s15 = int_to_ptr.vmem [resolvable:$true] %s20_s15 }
   0x2   :  { %25 = vst [vmem:[#allocation7] sm:$0x1] %v24_v0  ;;  %s2137_s18 = scalar_lea.vmem %s21_s15, 16  ;;  %p2142_p1 = scmp.lt.s32.totalorder %s21_s15, %s21_s15 }
   0x3   :  { %p2138_p0 = scmp.ne.s32.totalorder %s21_s15, %s2137_s18  ;;  %p2143_p2 = scmp.lt.s32.totalorder %s2137_s18, %s2137_s18 }
   0x5   :  { %p2144_p3 = por %p2143_p2, %p2142_p1 }
   0x7   :  { %p2145_p4 = pnand %p2144_p3, %p2138_p0 }
   0x9   :  { %2148 = shalt.err (!%p2145_p4)  }
   0xa   :  { %s2323_s19 = smov [#allocation6]  }
   0xb   :  { %23 = dma.vmem_to_smem %s21_s15, 16, %s2323_s19, [#allocation5] }
   0xc   :  { %2309 = dma.done.wait [#allocation5], 16 }
   0xd   :  { %2310 = vsyncadd [#allocation5], 4294967280 }
   0xe   :  { %27 = sfence }
   0xf   :  { %28 = vsyncpa [#allocation9], 0 }
  0x10   :  { %29 = vsyncpa [#allocation12], 0 }
  0x11   :  { %30 = vsyncpa [#allocation15], 0 }
  0x12   :  { %31 = vsyncpa [#allocation18], 0 }
  0x13   :  { %32 = vsyncpa [#allocation10], 0 }
  0x14   :  { %33 = vsyncpa [#allocation21], 0  ;;  %s2324_s0 = smov [#allocation11]  }
  0x15   :  { %s60_s11 = sshll.u32 %s2324_s0, 4  ;;  %s61_s11 = int_to_ptr.vmem [resolvable:$true] %s60_s11 }
  0x16   :  { %s2157_s20 = scalar_lea.vmem %s61_s11, 16  ;;  %s2161_s21 = scalar_lea.vmem %s61_s11, 32 }
  0x17   :  { %p2158_p5 = scmp.ne.s32.totalorder %s61_s11, %s2157_s20  ;;  %p2162_p6 = scmp.lt.s32.totalorder %s61_s11, %s61_s11 }
  0x18   :  { %p2163_p7 = scmp.lt.s32.totalorder %s2161_s21, %s2157_s20 }
  0x1a   :  { %p2164_p8 = por %p2163_p7, %p2162_p6 }
  0x1c   :  { %p2165_p9 = pnand %p2164_p8, %p2158_p5 }
  0x1e   :  { %2168 = shalt.err (!%p2165_p9)
}
  0x1f   :  { %63 = dma.hbm_to_vmem [thread:$0]  %s2949_s6, 16, %s61_s11, [#allocation12]  }
  0x20   :  { %s2325_s24 = smov [#allocation14]   ;;  %s2326_s26 = smov [#allocation8]  }
  0x21   :  { %s81_s25 = sshll.u32 %s2325_s24, 4  ;;  %s47_s27 = sshll.u32 %s2326_s26, 4  ;;  %s82_s25 = int_to_ptr.vmem [resolvable:$true] %s81_s25  ;;  %s48_s27 = int_to_ptr.vmem [resolvable:$true] %s47_s27 }
  0x22   :  { %s2177_s28 = scalar_lea.vmem %s82_s25, 512  ;;  %p2182_p11 = scmp.lt.s32.totalorder %s82_s25, %s82_s25 }
  0x23   :  { %p2178_p10 = scmp.ne.s32.totalorder %s82_s25, %s2177_s28  ;;  %p2183_p12 = scmp.lt.s32.totalorder %s2177_s28, %s2177_s28 }
  0x25   :  { %p2184_p13 = por %p2183_p12, %p2182_p11 }
  0x27   :  { %p2185_p0 = pnand %p2184_p13, %p2178_p10 }
  0x29   :  { %2188 = shalt.err (!%p2185_p0)
}
  0x2a   :  { %s2327_s29 = smov 128   ;;  %s2328_s30 = smov 8  }
  0x2b   :  { %87 = dma.hbm_to_vmem [thread:$0]  %s2951_s8, 512, %s82_s25, [#allocation15], %s2327_s29, %s2327_s29, %s2328_s30  }
  0x2c   :  { %s2197_s6 = scalar_lea.vmem %s48_s27, 512  ;;  %p2202_p2 = scmp.lt.s32.totalorder %s48_s27, %s48_s27 }
  0x2d   :  { %p2198_p1 = scmp.ne.s32.totalorder %s48_s27, %s2197_s6  ;;  %p2203_p3 = scmp.lt.s32.totalorder %s2197_s6, %s2197_s6 }
  0x2f   :  { %p2204_p4 = por %p2203_p3, %p2202_p2 }
  0x31   :  { %p2205_p5 = pnand %p2204_p4, %p2198_p1 }
  0x33   :  { %2208 = shalt.err (!%p2205_p5)
}
  0x34   :  { %53 = dma.hbm_to_vmem [thread:$0]  %s2948_s5, 512, %s48_s27, [#allocation9], %s2327_s29, %s2327_s29, %s2328_s30  }
  0x35   :  { %s2329_s19 = smov [#allocation13]   ;;  %s2330_s11 = smov [#allocation16]  }
  0x36   :  { %s69_s0 = sshll.u32 %s2329_s19, 4  ;;  %s94_s20 = sshll.u32 %s2330_s11, 4  ;;  %s70_s0 = int_to_ptr.vmem [resolvable:$true] %s69_s0  ;;  %s95_s20 = int_to_ptr.vmem [resolvable:$true] %s94_s20 }
  0x37   :  { %s2217_s21 = scalar_lea.vmem %s70_s0, 512  ;;  %p2222_p7 = scmp.lt.s32.totalorder %s70_s0, %s70_s0 }
  0x38   :  { %p2218_p6 = scmp.ne.s32.totalorder %s70_s0, %s2217_s21  ;;  %p2223_p8 = scmp.lt.s32.totalorder %s2217_s21, %s2217_s21 }
  0x3a   :  { %p2224_p9 = por %p2223_p8, %p2222_p7 }
  0x3c   :  { %p2225_p10 = pnand %p2224_p9, %p2218_p6 }
  0x3e   :  { %2228 = shalt.err (!%p2225_p10)
}
  0x3f   :  { %75 = dma.hbm_to_vmem [thread:$0]  %s2950_s7, 512, %s70_s0, [#allocation12], %s2327_s29, %s2327_s29, %s2328_s30  }
  0x40   :  { %s2237_s23 = scalar_lea.vmem %s95_s20, 16  ;;  %s2241_s5 = scalar_lea.vmem %s95_s20, 32 }
  0x41   :  { %p2238_p11 = scmp.ne.s32.totalorder %s95_s20, %s2237_s23  ;;  %p2242_p12 = scmp.lt.s32.totalorder %s95_s20, %s95_s20 }
  0x42   :  { %p2243_p13 = scmp.lt.s32.totalorder %s2241_s5, %s2237_s23 }
  0x44   :  { %p2244_p0 = por %p2243_p13, %p2242_p12 }
  0x46   :  { %p2245_p1 = pnand %p2244_p0, %p2238_p11 }
  0x48   :  { %2248 = shalt.err (!%p2245_p1)
}
  0x49   :  { %97 = dma.hbm_to_vmem [thread:$0]  %s2952_s9, 16, %s95_s20, [#allocation15]  }
  0x4a   :  { %s2331_s26 = smov [#allocation17]  }
  0x4b   :  { %s104_s27 = sshll.u32 %s2331_s26, 4  ;;  %s105_s27 = int_to_ptr.vmem [resolvable:$true] %s104_s27 }
  0x4c   :  { %s2257_s28 = scalar_lea.vmem %s105_s27, 16  ;;  %s2261_s15 = scalar_lea.vmem %s105_s27, 32 }
  0x4d   :  { %p2258_p2 = scmp.ne.s32.totalorder %s105_s27, %s2257_s28  ;;  %p2262_p3 = scmp.lt.s32.totalorder %s105_s27, %s105_s27 }
  0x4e   :  { %p2263_p4 = scmp.lt.s32.totalorder %s2261_s15, %s2257_s28 }
  0x50   :  { %p2264_p5 = por %p2263_p4, %p2262_p3 }
  0x52   :  { %p2265_p6 = pnand %p2264_p5, %p2258_p2 }
  0x54   :  { %2268 = shalt.err (!%p2265_p6)
}
  0x55   :  { %107 = dma.hbm_to_vmem [thread:$0]  %s2953_s10, 16, %s105_s27, [#allocation18]  }
  0x56   :  { %2311 = dma.done.wait [#allocation9], 512  }
  0x57   :  { %2312 = vsyncadd [#allocation9], 4294966784 }
  0x58   :  { %2313 = dma.done.wait [#allocation12], 528  }
  0x59   :  { %2314 = vsyncadd [#allocation12], 4294966768 }
  0x5a   :  { %2315 = dma.done.wait [#allocation15], 528  }
  0x5b   :  { %2316 = vsyncadd [#allocation15], 4294966768 }
  0x5c   :  { %2317 = dma.done.wait [#allocation18], 16  }
  0x5d   :  { %2318 = vsyncadd [#allocation18], 4294967280  ;;  %v2332_v1 = vmov 0   ;;  %vm162_vm0 = vcmask 261120   ;;  %v154_v2 = vld [vmem:[#allocation8 + $0x18] sm:$0xff]  ;;  %v153_v3 = vld [vmem:[#allocation8 + $0x10] sm:$0xff] }
  0x5e   :  { %2067 = vset.pattern.permute.xlu0 %v2332_v1  ;;  %2068 = vset.pattern.permute.xlu1 %v2332_v1  ;;  %v149_v4 = vld [vmem:[%s2944_s1] sm:$0xff]  ;;  %v151_v7 = vld [vmem:[#allocation8] sm:$0xff]  ;;  %v150_v8 = vld [vmem:[%s2944_s1 + $0x8] sm:$0xff]  ;;  %vm136_vm1 = vcmask 254976   ;;  %v2333_v20 = vmov 0.0   ;;  %vm2334_vm2 = vmmov 0  }
  0x5f   :  { %1939 = vmatprep.subr.mxu0 %v154_v2  ;;  %v152_v5 = vld [vmem:[#allocation8 + $0x8] sm:$0xff]  ;;  %1947 = vmatprep.mubr.msk.f32.mxu0 %vm162_vm0, %v149_v4  ;;  %v251_v9 = vld [vmem:[#allocation13 + $0x18] sm:$0xff]  ;;  %v250_v10 = vld [vmem:[#allocation13 + $0x10] sm:$0xff]  ;;  %s2335_s29 = smov 32   ;;  %s2336_s9 = smov 64  }
  0x60   :  { %1940 = vmatpush3.msra.mxu0 %v154_v2  ;;  %v344_v6 = vld [vmem:[%s2945_s2] sm:$0x3]  ;;  %1950 = vmatprep.subr.mxu1 %v251_v9  ;;  %v248_v12 = vld [vmem:[#allocation13] sm:$0xff]  ;;  %v133_v14 = vld [vmem:[%s2946_s3 + $0x2] sm:$0x3]  ;;  %s2337_s16 = smov 96  }
  0x61   :  { %1941 = vmatprep.subr.mxu0 %v153_v3  ;;  %350 = vperm.xlu0 %2067, %v344_v6   ;;  %v249_v11 = vld [vmem:[#allocation13 + $0x8] sm:$0xff]  ;;  %138 = vst.msk [vmem:[#allocation19 + $0x2] sm:$0x3] %vm136_vm1, %v133_v14  ;;  %v134_v15 = vld [vmem:[%s2946_s3 + $0x4] sm:$0x3]  ;;  %v2465_v17 = vld [vmem:[#allocation14 + $0x18] sm:$0xff] }
  0x62   :  { %1942 = vmatpush3.msra.mxu0 %v153_v3  ;;  %1951 = vmatpush3.msra.mxu1 %v251_v9  ;;  %v132_v13 = vld [vmem:[%s2946_s3] sm:$0x3]  ;;  %v135_v16 = vld [vmem:[%s2946_s3 + $0x6] sm:$0x3]  ;;  %v142_v19 = vld [vmem:[%s2947_s4 + $0x2] sm:$0x3] }
  0x63   :  { %1943 = vmatprep.subr.mxu0 %v152_v5  ;;  %1952 = vmatprep.subr.mxu1 %v250_v10  ;;  %137 = vst.msk [vmem:[#allocation19] sm:$0x3] %vm136_vm1, %v132_v13  ;;  %v141_v18 = vld [vmem:[%s2947_s4] sm:$0x3]  ;;  %139 = vst.msk [vmem:[#allocation19 + $0x4] sm:$0x3] %vm136_vm1, %v134_v15 }
  0x64   :  { %1944 = vmatpush3.msra.mxu0 %v152_v5  ;;  %1953 = vmatpush3.msra.mxu1 %v250_v10  ;;  %140 = vst.msk [vmem:[#allocation19 + $0x6] sm:$0x3] %vm136_vm1, %v135_v16  ;;  %v143_v21 = vld [vmem:[%s2947_s4 + $0x4] sm:$0x3]  ;;  %v144_v22 = vld [vmem:[%s2947_s4 + $0x6] sm:$0x3] }
  0x65   :  { %1945 = vmatprep.subr.mxu0 %v151_v7  ;;  %1954 = vmatprep.subr.mxu1 %v249_v11  ;;  %145 = vst.msk [vmem:[#allocation20] sm:$0x3] %vm136_vm1, %v141_v18  ;;  %146 = vst.msk [vmem:[#allocation20 + $0x2] sm:$0x3] %vm136_vm1, %v142_v19  ;;  %v2484_v23 = vld [vmem:[#allocation14 + $0x10] sm:$0xff]  ;;  %v2493_v24 = vld [vmem:[#allocation14 + $0x8] sm:$0xff] }
  0x66   :  { %1946 = vmatpush3.msra.mxu0 %v151_v7  ;;  %1955 = vmatpush3.msra.mxu1 %v249_v11  ;;  %147 = vst.msk [vmem:[#allocation20 + $0x4] sm:$0x3] %vm136_vm1, %v143_v21  ;;  %148 = vst.msk [vmem:[#allocation20 + $0x6] sm:$0x3] %vm136_vm1, %v144_v22  ;;  %v2497_v25 = vld [vmem:[#allocation14] sm:$0xff]  ;;  %s343_s4 = sld [smem:[#allocation6]] }
  0x67   :  { %1948 = vmatmul.mubr.msk.f32.vlgmr.msra.gmra.mxu0 %vm162_vm0, %v150_v8  ;;  %1956 = vmatprep.subr.mxu1 %v248_v12  ;;  %v1841_v54 = vld [vmem:[#allocation11] ss:$0 sm:$0xff]  ;;  %v1844_v63 = vld [vmem:[#allocation16] ss:$0 sm:$0xff]  ;;  %v1851_v19 = vld [vmem:[%s2945_s2 + $0x2] sm:$0x3] }
  0x68   :  { %1957 = vmatpush3.msra.mxu1 %v248_v12  ;;  %1961 = vmatprep.subr.mxu0 %v2333_v20  ;;  %v358_v33 = vld [vmem:[#allocation19 + $0x2] sm:$0x3]  ;;  %s2560_s6 = sld [smem:[#allocation6 + $0x1]]  ;;  %s2339_s3 = smov [#allocation20]  }
  0x69   :  { %1972 = vmatprep.subr.mxu1 %v2333_v20  ;;  %1962 = vmatpush3.msra.mxu0 %v2465_v17  ;;  %s2615_s11 = sld [smem:[#allocation6 + $0x2]]  ;;  %s1788_s27 = sshll.u32 %s2339_s3, 4  ;;  %s1789_s27 = int_to_ptr.vmem [resolvable:$true] %s1788_s27 }
  0x6a   :  { %1969 = vmatprep.mubr.msk.f32.mxu0 %vm2334_vm2, %v2333_v20  ;;  %1963 = vmatprep.subr.mxu0 %v2333_v20  ;;  %v357_v27 = vld [vmem:[#allocation19] sm:$0x3]  ;;  %v359_v35 = vld [vmem:[#allocation19 + $0x4] sm:$0x3]  ;;  %s2669_s5 = sld [smem:[#allocation6 + $0x3]] }
  0x6b   :  { %1964 = vmatpush3.msra.mxu0 %v2484_v23  ;;  %v360_v36 = vld [vmem:[#allocation19 + $0x6] sm:$0x3] }
  0x6c   :  { %1965 = vmatprep.subr.mxu0 %v2333_v20  ;;  %s1847_s28 = sshll.u32 %s343_s4, 1  ;;  %v365_v26 = vld [vmem:[#allocation20] sm:$0x3]  ;;  %v366_v28 = vld [vmem:[#allocation20 + $0x2] sm:$0x3]  ;;  %s2723_s4 = sld [smem:[#allocation6 + $0x4]] }
  0x6d   :  { %1966 = vmatpush3.msra.mxu0 %v2493_v24  ;;  %v367_v29 = vld [vmem:[#allocation20 + $0x4] sm:$0x3]  ;;  %v368_v30 = vld [vmem:[#allocation20 + $0x6] sm:$0x3]  ;;  %s2503_s15 = scalar_lea.vmem [#allocation20], %s1847_s28  ;;  %s2506_s7 = scalar_lea.vmem [#allocation19], %s1847_s28 }
  0x6e   :  { %1967 = vmatprep.subr.mxu0 %v2333_v20  ;;  %v355_v31 = vld [vmem:[%s2503_s15] sm:$0x3]  ;;  %s1852_s17 = sshll.u32 %s2560_s6, 1  ;;  %s1870_s6 = sld [smem:[#allocation6 + $0x5]] }
  0x6f   :  { %1968 = vmatpush3.msra.mxu0 %v2497_v25  ;;  %v347_v32 = vld [vmem:[%s2506_s7] sm:$0x3]  ;;  %s2572_s18 = scalar_lea.vmem [#allocation19], %s1852_s17  ;;  %s2590_s19 = scalar_lea.vmem [#allocation20], %s1852_s17 }
  0x70   :  { %1983 = vmatprep.subr.mxu0 %v2333_v20  ;;  %s1857_s20 = sshll.u32 %s2615_s11, 1  ;;  %s1862_s24 = sshll.u32 %s2669_s5, 1 }
  0x71   :  { %s2626_s21 = scalar_lea.vmem [#allocation19], %s1857_s20  ;;  %s2644_s8 = scalar_lea.vmem [#allocation20], %s1857_s20 }
  0x72   :  { %s2680_s25 = scalar_lea.vmem [#allocation19], %s1862_s24  ;;  %s2698_s26 = scalar_lea.vmem [#allocation20], %s1862_s24 }
  0x73   :  { %s1867_s28 = sshll.u32 %s2723_s4, 1  ;;  %s1875_s11 = sld [smem:[#allocation6 + $0x6]] }
  0x74   :  { %s1872_s17 = sshll.u32 %s1870_s6, 1  ;;  %s1880_s5 = sld [smem:[#allocation6 + $0x7]] }
  0x79   :  { %s1877_s20 = sshll.u32 %s1875_s11, 1 }
  0x7a   :  { %s1882_s24 = sshll.u32 %s1880_s5, 1 }
  0xdc   :  { %v351_v34 = vpop.permute.xlu0 %350 }
  0xdd   :  { %v369_v37 = vmul.f32 %v365_v26, %v351_v34  ;;  %v370_v38 = vmul.f32 %v366_v28, %v351_v34  ;;  %v371_v39 = vmul.f32 %v367_v29, %v351_v34  ;;  %v372_v40 = vmul.f32 %v368_v30, %v351_v34 }
  0xde   :  { %v2509_v41 = vmul.f32 %v351_v34, %v347_v32  ;;  %v356_v42 = vmul.f32 %v355_v31, %v351_v34  ;;  %v361_v43 = vmul.f32 %v357_v27, %v351_v34  ;;  %v362_v44 = vmul.f32 %v358_v33, %v351_v34 }
  0xdf   :  { %492 = vst.msk [vmem:[#allocation20] sm:$0x3] %vm136_vm1, %v369_v37  ;;  %493 = vst.msk [vmem:[#allocation20 + $0x2] sm:$0x3] %vm136_vm1, %v370_v38  ;;  %v363_v45 = vmul.f32 %v359_v35, %v351_v34  ;;  %v364_v46 = vmul.f32 %v360_v36, %v351_v34 }
  0xe0   :  { %494 = vst.msk [vmem:[#allocation20 + $0x4] sm:$0x3] %vm136_vm1, %v371_v39  ;;  %495 = vst.msk [vmem:[#allocation20 + $0x6] sm:$0x3] %vm136_vm1, %v372_v40  ;;  %1970 = vmatmul.mubr.msk.f32.vlgmr.msra.gmra.mxu0 %vm162_vm0, %v2509_v41  ;;  %468 = vrot.lane.b32.xlu1 %v356_v42, %s2335_s29  ;;  %v374_v47 = vsel %vm136_vm1, %v361_v43, 0.0  ;;  %v375_v48 = vsel %vm136_vm1, %v362_v44, 0.0 }
  0xe1   :  { %488 = vst.msk [vmem:[#allocation19] sm:$0x3] %vm136_vm1, %v361_v43  ;;  %489 = vst.msk [vmem:[#allocation19 + $0x2] sm:$0x3] %vm136_vm1, %v362_v44  ;;  %v376_v49 = vadd.f32 %v375_v48, %v374_v47  ;;  %v377_v50 = vsel %vm136_vm1, %v363_v45, 0.0  ;;  %1984 = vmatpush3.msra.mxu0 %v2465_v17  ;;  %1991 = vmatprep.mubr.msk.f32.mxu0 %vm2334_vm2, %v2333_v20  ;;  %v379_v51 = vsel %vm136_vm1, %v364_v46, 0.0 }
  0xe2   :  { %490 = vst.msk [vmem:[#allocation19 + $0x4] sm:$0x3] %vm136_vm1, %v363_v45  ;;  %491 = vst.msk [vmem:[#allocation19 + $0x6] sm:$0x3] %vm136_vm1, %v364_v46  ;;  %1985 = vmatprep.subr.mxu0 %v2333_v20 }
  0xe3   :  { %v378_v52 = vadd.f32 %v377_v50, %v376_v49  ;;  %1986 = vmatpush3.msra.mxu0 %v2484_v23 }
  0xe4   :  { %1987 = vmatprep.subr.mxu0 %v2333_v20 }
  0xe5   :  { %v2532_v53 = vadd.f32 %v379_v51, %v378_v52  ;;  %1988 = vmatpush3.msra.mxu0 %v2493_v24 }
  0xe6   :  { %1989 = vmatprep.subr.mxu0 %v2333_v20 }
  0xe7   :  { %1990 = vmatpush3.msra.mxu0 %v2497_v25 }
  0xe8   :  { %2005 = vmatprep.subr.mxu0 %v2333_v20 }
 0x127   :  { %v1949_v55 = vpop.f32.mrf.mxu0 }
 0x128   :  { %v241_v56 = vadd.f32 %v1949_v55, %v1841_v54 }
 0x129   :  { %v235_v57 = vpop.f32.mrf.mxu0 }
 0x12a   :  { %v245_v58 = vmax.f32 %v241_v56, 0.0  ;;  %v236_v59 = vadd.f32 %v1841_v54, %v235_v57 }
 0x12c   :  { %247 = vst.msk [vmem:[#allocation2 + $0x8] sm:$0xff] %vm162_vm0, %v245_v58  ;;  %v244_v60 = vmax.f32 %v236_v59, 0.0 }
 0x12e   :  { %246 = vst.msk [vmem:[#allocation2] sm:$0xff] %vm162_vm0, %v244_v60  ;;  %1958 = vmatprep.mubr.msk.f32.mxu1 %vm162_vm0, %v244_v60 }
 0x12f   :  { %1959 = vmatmul.mubr.msk.f32.vlgmr.msra.gmra.mxu1 %vm162_vm0, %v245_v58 }
 0x130   :  { %1973 = vmatpush3.msra.mxu1 %v2465_v17  ;;  %1980 = vmatprep.mubr.msk.f32.mxu1 %vm2334_vm2, %v2333_v20 }
 0x131   :  { %1974 = vmatprep.subr.mxu1 %v2333_v20 }
 0x132   :  { %1975 = vmatpush3.msra.mxu1 %v2484_v23 }
 0x133   :  { %1976 = vmatprep.subr.mxu1 %v2333_v20 }
 0x134   :  { %1977 = vmatpush3.msra.mxu1 %v2493_v24 }
 0x135   :  { %1978 = vmatprep.subr.mxu1 %v2333_v20 }
 0x136   :  { %1979 = vmatpush3.msra.mxu1 %v2497_v25 }
 0x137   :  { %1994 = vmatprep.subr.mxu1 %v2333_v20 }
 0x152   :  { %v469_v13 = vpop.permute.xlu1 %468 }
 0x1a0   :  { %v455_v61 = vpop.f32.mrf.mxu0 }
 0x1a2   :  { %v1971_v62 = vpop.f32.mrf.mxu0 }
 0x1ef   :  { %v1960_v0 = vpop.f32.mrf.mxu1 }
 0x1f0   :  { %v337_v1 = vadd.f32 %v1960_v0, %v1844_v63 }
 0x1f1   :  { %v331_v2 = vpop.f32.mrf.mxu1 }
 0x1f2   :  { %341 = vst [vmem:[#allocation3 + $0x8] sm:$0xff] %v337_v1  ;;  %v332_v3 = vadd.f32 %v1844_v63, %v331_v2 }
 0x1f4   :  { %340 = vst [vmem:[#allocation3] sm:$0xff] %v332_v3 }
 0x1fb   :  { %v381_v4 = vld [vmem:[#allocation3] sm:$0x3]  ;;  %v550_v59 = vld [vmem:[#allocation3 + $0x2] sm:$0x3] }
 0x1fc   :  { %v459_v5 = vadd.f32 %v455_v61, %v381_v4 }
 0x1fe   :  { %2069 = vtanh.f32 %v459_v5  ;;  %v1849_v7 = vmul.f32 -1.442695, %v459_v5 }
 0x200   :  { %2071 = vpow2.f32 %v1849_v7 }
 0x20b   :  { %v2070_v6 = vpop.eup %2069 }
 0x20c   :  { %473 = vrot.lane.b32.xlu0 %v2070_v6, %s2336_s9 }
 0x20d   :  { %v2072_v8 = vpop.eup %2071 }
 0x20e   :  { %v463_v9 = vadd.f32 1.0, %v2072_v8 }
 0x210   :  { %2073 = vrcp.f32 %v463_v9 }
 0x21d   :  { %v2074_v10 = vpop.eup %2073 }
 0x21e   :  { %v471_v14 = vmul.f32 %v2074_v10, %v469_v13 }
 0x27e   :  { %v474_v11 = vpop.permute.xlu0 %473 }
 0x27f   :  { %v476_v12 = vmul.f32 %v2074_v10, %v474_v11  ;;  %v1856_v11 = vld [vmem:[%s2945_s2 + $0x4] sm:$0x3] }
 0x281   :  { %478 = vrot.lane.b32.xlu1 %v476_v12, %s2335_s29 }
 0x2f3   :  { %v479_v15 = vpop.permute.xlu1 %478 }
 0x2f4   :  { %v481_v16 = vadd.f32 %v479_v15, %v471_v14 }
 0x2f6   :  { %2075 = vtanh.f32 %v481_v16 }
 0x303   :  { %v2076_v18 = vpop.eup %2075 }
 0x304   :  { %484 = vrot.lane.b32.xlu0 %v2076_v18, %s2336_s9 }
 0x308   :  { %519 = vperm.xlu0 %2067, %v1851_v19  }
 0x376   :  { %v485_v21 = vpop.permute.xlu0 %484 }
 0x377   :  { %v487_v22 = vmul.f32 %v2074_v10, %v485_v21 }
 0x379   :  { %497 = vrot.lane.b32.xlu1 %v487_v22, %s2335_s29 }
 0x37d   :  { %502 = vrot.lane.b32.xlu1 %v481_v16, %s2337_s16 }
 0x383   :  { %v520_v31 = vpop.permute.xlu0 %519 }
 0x3eb   :  { %v498_v26 = vpop.permute.xlu1 %497 }
 0x3ec   :  { %500 = vst.msk [vmem:[%s2506_s7] sm:$0x3] %vm136_vm1, %v498_v26  ;;  %v506_v27 = vadd.f32 %v498_v26, %v2532_v53  ;;  %s2751_s7 = scalar_lea.vmem [#allocation20], %s1867_s28 }
 0x3ee   :  { %v507_v28 = vsub.f32 %v506_v27, %v2509_v41 }
 0x3ef   :  { %v503_v29 = vpop.permute.xlu1 %502 }
 0x3f0   :  { %v508_v30 = vmul.f32 0.25, %v507_v28  ;;  %505 = vst.msk [vmem:[%s2503_s15] sm:$0x3] %vm136_vm1, %v503_v29  ;;  %s2734_s15 = scalar_lea.vmem [#allocation19], %s1867_s28 }
 0x3f2   :  { %509 = vst.msk [vmem:[#allocation4] sm:$0x3] %vm136_vm1, %v508_v30 }
 0x3f3   :  { %v516_v32 = vld [vmem:[%s2572_s18] sm:$0x3]  ;;  %v526_v33 = vld [vmem:[#allocation19] sm:$0x3]  ;;  %v527_v34 = vld [vmem:[#allocation19 + $0x2] sm:$0x3] }
 0x3f4   :  { %v528_v35 = vld [vmem:[#allocation19 + $0x4] sm:$0x3]  ;;  %v529_v36 = vld [vmem:[#allocation19 + $0x6] sm:$0x3]  ;;  %v2575_v37 = vmul.f32 %v520_v31, %v516_v32  ;;  %v530_v38 = vmul.f32 %v526_v33, %v520_v31  ;;  %v531_v39 = vmul.f32 %v527_v34, %v520_v31 }
 0x3f5   :  { %v532_v40 = vmul.f32 %v528_v35, %v520_v31  ;;  %v533_v41 = vmul.f32 %v529_v36, %v520_v31 }
 0x3f6   :  { %1981 = vmatmul.mubr.msk.f32.vlgmr.msra.gmra.mxu1 %vm162_vm0, %v2575_v37  ;;  %v542_v42 = vsel %vm136_vm1, %v530_v38, 0.0  ;;  %v543_v43 = vsel %vm136_vm1, %v531_v39, 0.0  ;;  %657 = vst.msk [vmem:[#allocation19] sm:$0x3] %vm136_vm1, %v530_v38  ;;  %658 = vst.msk [vmem:[#allocation19 + $0x2] sm:$0x3] %vm136_vm1, %v531_v39 }
 0x3f7   :  { %v534_v44 = vld [vmem:[#allocation20] sm:$0x3]  ;;  %v535_v45 = vld [vmem:[#allocation20 + $0x2] sm:$0x3]  ;;  %v536_v46 = vld [vmem:[#allocation20 + $0x4] sm:$0x3]  ;;  %v544_v47 = vadd.f32 %v543_v43, %v542_v42  ;;  %1995 = vmatpush3.msra.mxu1 %v2465_v17  ;;  %2002 = vmatprep.mubr.msk.f32.mxu1 %vm2334_vm2, %v2333_v20 }
 0x3f8   :  { %659 = vst.msk [vmem:[#allocation19 + $0x4] sm:$0x3] %vm136_vm1, %v532_v40  ;;  %660 = vst.msk [vmem:[#allocation19 + $0x6] sm:$0x3] %vm136_vm1, %v533_v41  ;;  %v537_v48 = vld [vmem:[#allocation20 + $0x6] sm:$0x3]  ;;  %v538_v49 = vmul.f32 %v534_v44, %v520_v31  ;;  %v539_v50 = vmul.f32 %v535_v45, %v520_v31  ;;  %v540_v51 = vmul.f32 %v536_v46, %v520_v31  ;;  %1996 = vmatprep.subr.mxu1 %v2333_v20 }
 0x3f9   :  { %v524_v52 = vld [vmem:[%s2590_s19] sm:$0x3]  ;;  %v545_v53 = vsel %vm136_vm1, %v532_v40, 0.0  ;;  %v541_v54 = vmul.f32 %v537_v48, %v520_v31  ;;  %1997 = vmatpush3.msra.mxu1 %v2484_v23  ;;  %v547_v57 = vsel %vm136_vm1, %v533_v41, 0.0 }
 0x3fa   :  { %v525_v55 = vmul.f32 %v524_v52, %v520_v31  ;;  %v546_v56 = vadd.f32 %v545_v53, %v544_v47  ;;  %661 = vst.msk [vmem:[#allocation20] sm:$0x3] %vm136_vm1, %v538_v49  ;;  %662 = vst.msk [vmem:[#allocation20 + $0x2] sm:$0x3] %vm136_vm1, %v539_v50  ;;  %1998 = vmatprep.subr.mxu1 %v2333_v20  ;;  %v720_v52 = vld [vmem:[#allocation3 + $0x4] sm:$0x3] }
 0x3fb   :  { %663 = vst.msk [vmem:[#allocation20 + $0x4] sm:$0x3] %vm136_vm1, %v540_v51  ;;  %664 = vst.msk [vmem:[#allocation20 + $0x6] sm:$0x3] %vm136_vm1, %v541_v54  ;;  %1999 = vmatpush3.msra.mxu1 %v2493_v24 }
 0x3fc   :  { %637 = vrot.lane.b32.xlu1 %v525_v55, %s2335_s29  ;;  %v548_v58 = vadd.f32 %v547_v57, %v546_v56  ;;  %2000 = vmatprep.subr.mxu1 %v2333_v20 }
 0x3fd   :  { %2001 = vmatpush3.msra.mxu1 %v2497_v25 }
 0x3fe   :  { %2016 = vmatprep.subr.mxu1 %v2333_v20 }
 0x46e   :  { %v638_v6 = vpop.permute.xlu1 %637 }
 0x4b6   :  { %v624_v60 = vpop.f32.mrf.mxu1 }
 0x4b7   :  { %v628_v61 = vadd.f32 %v624_v60, %v550_v59 }
 0x4b8   :  { %v1982_v62 = vpop.f32.mrf.mxu1 }
 0x4b9   :  { %2077 = vtanh.f32 %v628_v61  ;;  %v1854_v0 = vmul.f32 -1.442695, %v628_v61 }
 0x4bb   :  { %2079 = vpow2.f32 %v1854_v0 }
 0x4c6   :  { %v2078_v63 = vpop.eup %2077 }
 0x4c7   :  { %642 = vrot.lane.b32.xlu0 %v2078_v63, %s2336_s9 }
 0x4c8   :  { %v2080_v1 = vpop.eup %2079 }
 0x4c9   :  { %v632_v2 = vadd.f32 1.0, %v2080_v1 }
 0x4cb   :  { %2081 = vrcp.f32 %v632_v2 }
 0x4d8   :  { %v2082_v3 = vpop.eup %2081 }
 0x4d9   :  { %v640_v7 = vmul.f32 %v2082_v3, %v638_v6 }
 0x539   :  { %v643_v4 = vpop.permute.xlu0 %642 }
 0x53a   :  { %v645_v5 = vmul.f32 %v2082_v3, %v643_v4  ;;  %v1861_v4 = vld [vmem:[%s2945_s2 + $0x6] sm:$0x3] }
 0x53c   :  { %647 = vrot.lane.b32.xlu0 %v645_v5, %s2335_s29 }
 0x5ae   :  { %v648_v8 = vpop.permute.xlu0 %647 }
 0x5af   :  { %v650_v9 = vadd.f32 %v648_v8, %v640_v7 }
 0x5b1   :  { %2083 = vtanh.f32 %v650_v9 }
 0x5be   :  { %v2084_v10 = vpop.eup %2083 }
 0x5bf   :  { %653 = vrot.lane.b32.xlu1 %v2084_v10, %s2336_s9 }
 0x5c3   :  { %689 = vperm.xlu1 %2068, %v1856_v11  }
 0x631   :  { %v654_v12 = vpop.permute.xlu1 %653 }
 0x632   :  { %v656_v13 = vmul.f32 %v2082_v3, %v654_v12 }
 0x634   :  { %666 = vrot.lane.b32.xlu0 %v656_v13, %s2335_s29 }
 0x638   :  { %671 = vrot.lane.b32.xlu0 %v650_v9, %s2337_s16 }
 0x63e   :  { %v690_v21 = vpop.permute.xlu1 %689 }
 0x6a6   :  { %v667_v14 = vpop.permute.xlu0 %666 }
 0x6a7   :  { %669 = vst.msk [vmem:[%s2572_s18] sm:$0x3] %vm136_vm1, %v667_v14  ;;  %v675_v15 = vadd.f32 %v667_v14, %v548_v58  ;;  %s2775_s18 = scalar_lea.vmem [#allocation19], %s1872_s17 }
 0x6a9   :  { %v676_v16 = vsub.f32 %v675_v15, %v2575_v37 }
 0x6aa   :  { %v672_v18 = vpop.permute.xlu0 %671 }
 0x6ab   :  { %v677_v19 = vmul.f32 0.25, %v676_v16  ;;  %674 = vst.msk [vmem:[%s2590_s19] sm:$0x3] %vm136_vm1, %v672_v18  ;;  %s2786_s19 = scalar_lea.vmem [#allocation20], %s1872_s17 }
 0x6ad   :  { %679 = vst.msk [vmem:[#allocation4 + $0x2] sm:$0x3] %vm136_vm1, %v677_v19 }
 0x6ae   :  { %v686_v22 = vld [vmem:[%s2626_s21] sm:$0x3]  ;;  %v696_v26 = vld [vmem:[#allocation19] sm:$0x3]  ;;  %v697_v27 = vld [vmem:[#allocation19 + $0x2] sm:$0x3] }
 0x6af   :  { %v2629_v28 = vmul.f32 %v690_v21, %v686_v22  ;;  %v698_v29 = vld [vmem:[#allocation19 + $0x4] sm:$0x3]  ;;  %v699_v30 = vld [vmem:[#allocation19 + $0x6] sm:$0x3]  ;;  %v700_v31 = vmul.f32 %v696_v26, %v690_v21  ;;  %v701_v32 = vmul.f32 %v697_v27, %v690_v21 }
 0x6b0   :  { %v702_v33 = vmul.f32 %v698_v29, %v690_v21  ;;  %v703_v34 = vmul.f32 %v699_v30, %v690_v21 }
 0x6b1   :  { %1992 = vmatmul.mubr.msk.f32.vlgmr.msra.gmra.mxu0 %vm162_vm0, %v2629_v28  ;;  %v712_v35 = vsel %vm136_vm1, %v700_v31, 0.0  ;;  %v713_v36 = vsel %vm136_vm1, %v701_v32, 0.0  ;;  %827 = vst.msk [vmem:[#allocation19] sm:$0x3] %vm136_vm1, %v700_v31  ;;  %828 = vst.msk [vmem:[#allocation19 + $0x2] sm:$0x3] %vm136_vm1, %v701_v32 }
 0x6b2   :  { %v704_v37 = vld [vmem:[#allocation20] sm:$0x3]  ;;  %v705_v38 = vld [vmem:[#allocation20 + $0x2] sm:$0x3]  ;;  %v706_v39 = vld [vmem:[#allocation20 + $0x4] sm:$0x3]  ;;  %v714_v40 = vadd.f32 %v713_v36, %v712_v35  ;;  %2006 = vmatpush3.msra.mxu0 %v2465_v17  ;;  %2013 = vmatprep.mubr.msk.f32.mxu0 %vm2334_vm2, %v2333_v20 }
 0x6b3   :  { %829 = vst.msk [vmem:[#allocation19 + $0x4] sm:$0x3] %vm136_vm1, %v702_v33  ;;  %830 = vst.msk [vmem:[#allocation19 + $0x6] sm:$0x3] %vm136_vm1, %v703_v34  ;;  %v707_v41 = vld [vmem:[#allocation20 + $0x6] sm:$0x3]  ;;  %v708_v42 = vmul.f32 %v704_v37, %v690_v21  ;;  %v709_v43 = vmul.f32 %v705_v38, %v690_v21  ;;  %v710_v44 = vmul.f32 %v706_v39, %v690_v21  ;;  %2007 = vmatprep.subr.mxu0 %v2333_v20 }
 0x6b4   :  { %v694_v45 = vld [vmem:[%s2644_s8] sm:$0x3]  ;;  %v715_v46 = vsel %vm136_vm1, %v702_v33, 0.0  ;;  %v711_v47 = vmul.f32 %v707_v41, %v690_v21  ;;  %2008 = vmatpush3.msra.mxu0 %v2484_v23  ;;  %v717_v50 = vsel %vm136_vm1, %v703_v34, 0.0 }
 0x6b5   :  { %v695_v48 = vmul.f32 %v694_v45, %v690_v21  ;;  %v716_v49 = vadd.f32 %v715_v46, %v714_v40  ;;  %831 = vst.msk [vmem:[#allocation20] sm:$0x3] %vm136_vm1, %v708_v42  ;;  %832 = vst.msk [vmem:[#allocation20 + $0x2] sm:$0x3] %vm136_vm1, %v709_v43  ;;  %2009 = vmatprep.subr.mxu0 %v2333_v20 }
 0x6b6   :  { %833 = vst.msk [vmem:[#allocation20 + $0x4] sm:$0x3] %vm136_vm1, %v710_v44  ;;  %834 = vst.msk [vmem:[#allocation20 + $0x6] sm:$0x3] %vm136_vm1, %v711_v47  ;;  %2010 = vmatpush3.msra.mxu0 %v2493_v24 }
 0x6b7   :  { %807 = vrot.lane.b32.xlu0 %v695_v48, %s2335_s29  ;;  %v718_v51 = vadd.f32 %v717_v50, %v716_v49  ;;  %2011 = vmatprep.subr.mxu0 %v2333_v20 }
 0x6b8   :  { %2012 = vmatpush3.msra.mxu0 %v2497_v25 }
 0x6b9   :  { %2027 = vmatprep.subr.mxu0 %v2333_v20 }
 0x729   :  { %v808_v63 = vpop.permute.xlu0 %807 }
 0x771   :  { %v794_v53 = vpop.f32.mrf.mxu0 }
 0x772   :  { %v798_v54 = vadd.f32 %v794_v53, %v720_v52 }
 0x773   :  { %v1993_v55 = vpop.f32.mrf.mxu0 }
 0x774   :  { %2085 = vtanh.f32 %v798_v54  ;;  %v1859_v57 = vmul.f32 -1.442695, %v798_v54 }
 0x776   :  { %2087 = vpow2.f32 %v1859_v57  ;;  %v1866_v57 = vld [vmem:[%s2945_s2 + $0x8] sm:$0x3] }
 0x781   :  { %v2086_v56 = vpop.eup %2085 }
 0x782   :  { %812 = vrot.lane.b32.xlu1 %v2086_v56, %s2336_s9 }
 0x783   :  { %v2088_v58 = vpop.eup %2087 }
 0x784   :  { %v802_v59 = vadd.f32 1.0, %v2088_v58 }
 0x786   :  { %2089 = vrcp.f32 %v802_v59 }
 0x793   :  { %v2090_v60 = vpop.eup %2089 }
 0x794   :  { %v810_v0 = vmul.f32 %v2090_v60, %v808_v63 }
 0x7f4   :  { %v813_v61 = vpop.permute.xlu1 %812 }
 0x7f5   :  { %v815_v62 = vmul.f32 %v2090_v60, %v813_v61 }
 0x7f7   :  { %817 = vrot.lane.b32.xlu1 %v815_v62, %s2335_s29 }
 0x869   :  { %v818_v1 = vpop.permute.xlu1 %817 }
 0x86a   :  { %v820_v2 = vadd.f32 %v818_v1, %v810_v0 }
 0x86c   :  { %2091 = vtanh.f32 %v820_v2 }
 0x879   :  { %v2092_v3 = vpop.eup %2091 }
 0x87a   :  { %823 = vrot.lane.b32.xlu0 %v2092_v3, %s2336_s9 }
 0x87e   :  { %859 = vperm.xlu0 %2067, %v1861_v4  }
 0x8ec   :  { %v824_v5 = vpop.permute.xlu0 %823 }
 0x8ed   :  { %v826_v6 = vmul.f32 %v2090_v60, %v824_v5 }
 0x8ef   :  { %836 = vrot.lane.b32.xlu1 %v826_v6, %s2335_s29 }
 0x8f3   :  { %841 = vrot.lane.b32.xlu1 %v820_v2, %s2337_s16 }
 0x8f9   :  { %v860_v12 = vpop.permute.xlu0 %859 }
 0x961   :  { %v837_v7 = vpop.permute.xlu1 %836 }
 0x962   :  { %839 = vst.msk [vmem:[%s2626_s21] sm:$0x3] %vm136_vm1, %v837_v7  ;;  %v845_v8 = vadd.f32 %v837_v7, %v718_v51  ;;  %s2820_s21 = scalar_lea.vmem [#allocation19], %s1877_s20 }
 0x964   :  { %v846_v9 = vsub.f32 %v845_v8, %v2629_v28 }
 0x965   :  { %v842_v10 = vpop.permute.xlu1 %841 }
 0x966   :  { %v847_v11 = vmul.f32 0.25, %v846_v9  ;;  %844 = vst.msk [vmem:[%s2644_s8] sm:$0x3] %vm136_vm1, %v842_v10  ;;  %s2831_s8 = scalar_lea.vmem [#allocation20], %s1877_s20 }
 0x968   :  { %849 = vst.msk [vmem:[#allocation4 + $0x4] sm:$0x3] %vm136_vm1, %v847_v11 }
 0x969   :  { %v856_v13 = vld [vmem:[%s2680_s25] sm:$0x3]  ;;  %v866_v14 = vld [vmem:[#allocation19] sm:$0x3]  ;;  %v867_v15 = vld [vmem:[#allocation19 + $0x2] sm:$0x3] }
 0x96a   :  { %v2683_v16 = vmul.f32 %v860_v12, %v856_v13  ;;  %v868_v18 = vld [vmem:[#allocation19 + $0x4] sm:$0x3]  ;;  %v869_v19 = vld [vmem:[#allocation19 + $0x6] sm:$0x3]  ;;  %v870_v21 = vmul.f32 %v866_v14, %v860_v12  ;;  %v871_v22 = vmul.f32 %v867_v15, %v860_v12 }
 0x96b   :  { %v872_v26 = vmul.f32 %v868_v18, %v860_v12  ;;  %v873_v27 = vmul.f32 %v869_v19, %v860_v12 }
 0x96c   :  { %2003 = vmatmul.mubr.msk.f32.vlgmr.msra.gmra.mxu1 %vm162_vm0, %v2683_v16  ;;  %v882_v28 = vsel %vm136_vm1, %v870_v21, 0.0  ;;  %v883_v29 = vsel %vm136_vm1, %v871_v22, 0.0  ;;  %997 = vst.msk [vmem:[#allocation19] sm:$0x3] %vm136_vm1, %v870_v21  ;;  %998 = vst.msk [vmem:[#allocation19 + $0x2] sm:$0x3] %vm136_vm1, %v871_v22 }
 0x96d   :  { %v874_v30 = vld [vmem:[#allocation20] sm:$0x3]  ;;  %v875_v31 = vld [vmem:[#allocation20 + $0x2] sm:$0x3]  ;;  %v876_v32 = vld [vmem:[#allocation20 + $0x4] sm:$0x3]  ;;  %v884_v33 = vadd.f32 %v883_v29, %v882_v28  ;;  %2017 = vmatpush3.msra.mxu1 %v2465_v17  ;;  %2024 = vmatprep.mubr.msk.f32.mxu1 %vm2334_vm2, %v2333_v20 }
 0x96e   :  { %999 = vst.msk [vmem:[#allocation19 + $0x4] sm:$0x3] %vm136_vm1, %v872_v26  ;;  %1000 = vst.msk [vmem:[#allocation19 + $0x6] sm:$0x3] %vm136_vm1, %v873_v27  ;;  %v877_v34 = vld [vmem:[#allocation20 + $0x6] sm:$0x3]  ;;  %v878_v35 = vmul.f32 %v874_v30, %v860_v12  ;;  %v879_v36 = vmul.f32 %v875_v31, %v860_v12  ;;  %v880_v37 = vmul.f32 %v876_v32, %v860_v12  ;;  %2018 = vmatprep.subr.mxu1 %v2333_v20 }
 0x96f   :  { %v864_v38 = vld [vmem:[%s2698_s26] sm:$0x3]  ;;  %v885_v39 = vsel %vm136_vm1, %v872_v26, 0.0  ;;  %v881_v40 = vmul.f32 %v877_v34, %v860_v12  ;;  %2019 = vmatpush3.msra.mxu1 %v2484_v23  ;;  %v887_v17 = vsel %vm136_vm1, %v873_v27, 0.0  ;;  %v890_v23 = vld [vmem:[#allocation3 + $0x6] sm:$0x3] }
 0x970   :  { %v865_v41 = vmul.f32 %v864_v38, %v860_v12  ;;  %v886_v42 = vadd.f32 %v885_v39, %v884_v33  ;;  %1001 = vst.msk [vmem:[#allocation20] sm:$0x3] %vm136_vm1, %v878_v35  ;;  %1002 = vst.msk [vmem:[#allocation20 + $0x2] sm:$0x3] %vm136_vm1, %v879_v36  ;;  %2020 = vmatprep.subr.mxu1 %v2333_v20  ;;  %v1060_v34 = vld [vmem:[#allocation3 + $0x8] sm:$0x3] }
 0x971   :  { %1003 = vst.msk [vmem:[#allocation20 + $0x4] sm:$0x3] %vm136_vm1, %v880_v37  ;;  %1004 = vst.msk [vmem:[#allocation20 + $0x6] sm:$0x3] %vm136_vm1, %v881_v40  ;;  %2021 = vmatpush3.msra.mxu1 %v2493_v24 }
 0x972   :  { %977 = vrot.lane.b32.xlu1 %v865_v41, %s2335_s29  ;;  %v888_v43 = vadd.f32 %v887_v17, %v886_v42  ;;  %2022 = vmatprep.subr.mxu1 %v2333_v20 }
 0x973   :  { %2023 = vmatpush3.msra.mxu1 %v2497_v25 }
 0x974   :  { %2038 = vmatprep.subr.mxu1 %v2333_v20 }
 0x9e4   :  { %v978_v25 = vpop.permute.xlu1 %977 }
 0xa2c   :  { %v964_v44 = vpop.f32.mrf.mxu1 }
 0xa2d   :  { %v968_v45 = vadd.f32 %v964_v44, %v890_v23 }
 0xa2e   :  { %v2004_v46 = vpop.f32.mrf.mxu1 }
 0xa2f   :  { %2093 = vtanh.f32 %v968_v45  ;;  %v1864_v48 = vmul.f32 -1.442695, %v968_v45 }
 0xa31   :  { %2095 = vpow2.f32 %v1864_v48  ;;  %v1871_v48 = vld [vmem:[%s2945_s2 + $0xa] sm:$0x3] }
 0xa3c   :  { %v2094_v47 = vpop.eup %2093 }
 0xa3d   :  { %982 = vrot.lane.b32.xlu0 %v2094_v47, %s2336_s9 }
 0xa3e   :  { %v2096_v49 = vpop.eup %2095 }
 0xa3f   :  { %v972_v50 = vadd.f32 1.0, %v2096_v49 }
 0xa41   :  { %2097 = vrcp.f32 %v972_v50 }
 0xa4e   :  { %v2098_v24 = vpop.eup %2097 }
 0xa4f   :  { %v980_v53 = vmul.f32 %v2098_v24, %v978_v25 }
 0xaaf   :  { %v983_v51 = vpop.permute.xlu0 %982 }
 0xab0   :  { %v985_v52 = vmul.f32 %v2098_v24, %v983_v51 }
 0xab2   :  { %987 = vrot.lane.b32.xlu0 %v985_v52, %s2335_s29 }
 0xb24   :  { %v988_v54 = vpop.permute.xlu0 %987 }
 0xb25   :  { %v990_v55 = vadd.f32 %v988_v54, %v980_v53 }
 0xb27   :  { %2099 = vtanh.f32 %v990_v55 }
 0xb34   :  { %v2100_v56 = vpop.eup %2099 }
 0xb35   :  { %993 = vrot.lane.b32.xlu1 %v2100_v56, %s2336_s9 }
 0xb39   :  { %1029 = vperm.xlu1 %2068, %v1866_v57  }
 0xba7   :  { %v994_v58 = vpop.permute.xlu1 %993 }
 0xba8   :  { %v996_v59 = vmul.f32 %v2098_v24, %v994_v58 }
 0xbaa   :  { %1006 = vrot.lane.b32.xlu0 %v996_v59, %s2335_s29 }
 0xbae   :  { %1011 = vrot.lane.b32.xlu0 %v990_v55, %s2337_s16 }
 0xbb4   :  { %v1030_v1 = vpop.permute.xlu1 %1029 }
 0xc1c   :  { %v1007_v60 = vpop.permute.xlu0 %1006 }
 0xc1d   :  { %v1015_v61 = vadd.f32 %v1007_v60, %v888_v43  ;;  %1009 = vst.msk [vmem:[%s2680_s25] sm:$0x3] %vm136_vm1, %v1007_v60  ;;  %s2868_s25 = scalar_lea.vmem [#allocation20], %s1882_s24 }
 0xc1f   :  { %v1016_v62 = vsub.f32 %v1015_v61, %v2683_v16 }
 0xc20   :  { %v1012_v63 = vpop.permute.xlu0 %1011 }
 0xc21   :  { %v1017_v0 = vmul.f32 0.25, %v1016_v62  ;;  %1014 = vst.msk [vmem:[%s2698_s26] sm:$0x3] %vm136_vm1, %v1012_v63 }
 0xc23   :  { %1019 = vst.msk [vmem:[#allocation4 + $0x6] sm:$0x3] %vm136_vm1, %v1017_v0 }
 0xc24   :  { %v1026_v2 = vld [vmem:[%s2734_s15] sm:$0x3]  ;;  %v1036_v3 = vld [vmem:[#allocation19] sm:$0x3]  ;;  %v1037_v4 = vld [vmem:[#allocation19 + $0x2] sm:$0x3] }
 0xc25   :  { %v2737_v5 = vmul.f32 %v1030_v1, %v1026_v2  ;;  %v1038_v6 = vld [vmem:[#allocation19 + $0x4] sm:$0x3]  ;;  %v1039_v7 = vld [vmem:[#allocation19 + $0x6] sm:$0x3]  ;;  %v1040_v8 = vmul.f32 %v1036_v3, %v1030_v1  ;;  %v1041_v9 = vmul.f32 %v1037_v4, %v1030_v1 }
 0xc26   :  { %v1042_v10 = vmul.f32 %v1038_v6, %v1030_v1  ;;  %v1043_v11 = vmul.f32 %v1039_v7, %v1030_v1 }
 0xc27   :  { %2014 = vmatmul.mubr.msk.f32.vlgmr.msra.gmra.mxu0 %vm162_vm0, %v2737_v5  ;;  %v1052_v12 = vsel %vm136_vm1, %v1040_v8, 0.0  ;;  %v1053_v13 = vsel %vm136_vm1, %v1041_v9, 0.0  ;;  %1167 = vst.msk [vmem:[#allocation19] sm:$0x3] %vm136_vm1, %v1040_v8  ;;  %1168 = vst.msk [vmem:[#allocation19 + $0x2] sm:$0x3] %vm136_vm1, %v1041_v9 }
 0xc28   :  { %v1044_v14 = vld [vmem:[#allocation20] sm:$0x3]  ;;  %v1045_v15 = vld [vmem:[#allocation20 + $0x2] sm:$0x3]  ;;  %v1046_v16 = vld [vmem:[#allocation20 + $0x4] sm:$0x3]  ;;  %v1054_v18 = vadd.f32 %v1053_v13, %v1052_v12  ;;  %2035 = vmatprep.mubr.msk.f32.mxu0 %vm2334_vm2, %v2333_v20 }
 0xc29   :  { %1169 = vst.msk [vmem:[#allocation19 + $0x4] sm:$0x3] %vm136_vm1, %v1042_v10  ;;  %1170 = vst.msk [vmem:[#allocation19 + $0x6] sm:$0x3] %vm136_vm1, %v1043_v11  ;;  %v1047_v19 = vld [vmem:[#allocation20 + $0x6] sm:$0x3]  ;;  %v1048_v21 = vmul.f32 %v1044_v14, %v1030_v1  ;;  %v1049_v22 = vmul.f32 %v1045_v15, %v1030_v1  ;;  %v1050_v26 = vmul.f32 %v1046_v16, %v1030_v1 }
 0xc2a   :  { %v1034_v27 = vld [vmem:[%s2751_s7] sm:$0x3]  ;;  %v1055_v28 = vsel %vm136_vm1, %v1042_v10, 0.0  ;;  %v1051_v29 = vmul.f32 %v1047_v19, %v1030_v1  ;;  %v1057_v32 = vsel %vm136_vm1, %v1043_v11, 0.0  ;;  %v1230_v19 = vld [vmem:[#allocation3 + $0xa] sm:$0x3] }
 0xc2b   :  { %v1035_v30 = vmul.f32 %v1034_v27, %v1030_v1  ;;  %v1056_v31 = vadd.f32 %v1055_v28, %v1054_v18  ;;  %1171 = vst.msk [vmem:[#allocation20] sm:$0x3] %vm136_vm1, %v1048_v21  ;;  %1172 = vst.msk [vmem:[#allocation20 + $0x2] sm:$0x3] %vm136_vm1, %v1049_v22 }
 0xc2c   :  { %1173 = vst.msk [vmem:[#allocation20 + $0x4] sm:$0x3] %vm136_vm1, %v1050_v26  ;;  %1174 = vst.msk [vmem:[#allocation20 + $0x6] sm:$0x3] %vm136_vm1, %v1051_v29 }
 0xc2d   :  { %1147 = vrot.lane.b32.xlu0 %v1035_v30, %s2335_s29  ;;  %v1058_v33 = vadd.f32 %v1057_v32, %v1056_v31 }
 0xc9f   :  { %v1148_v23 = vpop.permute.xlu0 %1147 }
 0xce7   :  { %v1134_v35 = vpop.f32.mrf.mxu0 }
 0xce8   :  { %v1138_v36 = vadd.f32 %v1134_v35, %v1060_v34 }
 0xce9   :  { %v2015_v37 = vpop.f32.mrf.mxu0 }
 0xcea   :  { %2101 = vtanh.f32 %v1138_v36  ;;  %v1869_v39 = vmul.f32 -1.442695, %v1138_v36 }
 0xcec   :  { %2103 = vpow2.f32 %v1869_v39  ;;  %v1876_v39 = vld [vmem:[%s2945_s2 + $0xc] sm:$0x3] }
 0xcf7   :  { %v2102_v38 = vpop.eup %2101 }
 0xcf8   :  { %1152 = vrot.lane.b32.xlu1 %v2102_v38, %s2336_s9 }
 0xcf9   :  { %v2104_v40 = vpop.eup %2103 }
 0xcfa   :  { %v1142_v41 = vadd.f32 1.0, %v2104_v40  ;;  %v1404_v40 = vld [vmem:[#allocation14 + $0x18] sm:$0xff] }
 0xcfb   :  { %2028 = vmatpush3.msra.mxu0 %v1404_v40 }
 0xcfc   :  { %2105 = vrcp.f32 %v1142_v41  ;;  %v1403_v41 = vld [vmem:[#allocation14 + $0x10] sm:$0xff]  ;;  %2029 = vmatprep.subr.mxu0 %v2333_v20 }
 0xcfd   :  { %2030 = vmatpush3.msra.mxu0 %v1403_v41 }
 0xcfe   :  { %2031 = vmatprep.subr.mxu0 %v2333_v20 }
 0xd09   :  { %v2106_v42 = vpop.eup %2105 }
 0xd0a   :  { %v1150_v44 = vmul.f32 %v2106_v42, %v1148_v23 }
 0xd6a   :  { %v1153_v17 = vpop.permute.xlu1 %1152 }
 0xd6b   :  { %v1155_v43 = vmul.f32 %v2106_v42, %v1153_v17  ;;  %v1401_v17 = vld [vmem:[#allocation14] sm:$0xff] }
 0xd6d   :  { %1157 = vrot.lane.b32.xlu1 %v1155_v43, %s2335_s29 }
 0xddf   :  { %v1158_v45 = vpop.permute.xlu1 %1157 }
 0xde0   :  { %v1160_v46 = vadd.f32 %v1158_v45, %v1150_v44 }
 0xde2   :  { %2107 = vtanh.f32 %v1160_v46 }
 0xdef   :  { %v2108_v47 = vpop.eup %2107 }
 0xdf0   :  { %1163 = vrot.lane.b32.xlu0 %v2108_v47, %s2336_s9 }
 0xdf4   :  { %1199 = vperm.xlu0 %2067, %v1871_v48  }
 0xe62   :  { %v1164_v49 = vpop.permute.xlu0 %1163 }
 0xe63   :  { %v1166_v50 = vmul.f32 %v2106_v42, %v1164_v49  ;;  %v1402_v42 = vld [vmem:[#allocation14 + $0x8] sm:$0xff] }
 0xe64   :  { %2032 = vmatpush3.msra.mxu0 %v1402_v42 }
 0xe65   :  { %1176 = vrot.lane.b32.xlu1 %v1166_v50, %s2335_s29  ;;  %2033 = vmatprep.subr.mxu0 %v2333_v20 }
 0xe66   :  { %2034 = vmatpush3.msra.mxu0 %v1401_v17 }
 0xe69   :  { %1181 = vrot.lane.b32.xlu1 %v1160_v46, %s2337_s16 }
 0xe6f   :  { %v1200_v54 = vpop.permute.xlu0 %1199 }
 0xed7   :  { %v1177_v24 = vpop.permute.xlu1 %1176 }
 0xed8   :  { %v1185_v51 = vadd.f32 %v1177_v24, %v1058_v33  ;;  %1179 = vst.msk [vmem:[%s2734_s15] sm:$0x3] %vm136_vm1, %v1177_v24 }
 0xeda   :  { %v1186_v52 = vsub.f32 %v1185_v51, %v2737_v5 }
 0xedb   :  { %v1182_v25 = vpop.permute.xlu1 %1181 }
 0xedc   :  { %v1187_v53 = vmul.f32 0.25, %v1186_v52  ;;  %1184 = vst.msk [vmem:[%s2751_s7] sm:$0x3] %vm136_vm1, %v1182_v25 }
 0xede   :  { %1189 = vst.msk [vmem:[#allocation4 + $0x8] sm:$0x3] %vm136_vm1, %v1187_v53 }
 0xedf   :  { %v1196_v55 = vld [vmem:[%s2775_s18] sm:$0x3]  ;;  %v1206_v56 = vld [vmem:[#allocation19] sm:$0x3]  ;;  %v1207_v57 = vld [vmem:[#allocation19 + $0x2] sm:$0x3] }
 0xee0   :  { %v2778_v58 = vmul.f32 %v1200_v54, %v1196_v55  ;;  %v1208_v59 = vld [vmem:[#allocation19 + $0x4] sm:$0x3]  ;;  %v1209_v60 = vld [vmem:[#allocation19 + $0x6] sm:$0x3]  ;;  %v1210_v61 = vmul.f32 %v1206_v56, %v1200_v54  ;;  %v1211_v62 = vmul.f32 %v1207_v57, %v1200_v54 }
 0xee1   :  { %v1212_v63 = vmul.f32 %v1208_v59, %v1200_v54  ;;  %v1213_v0 = vmul.f32 %v1209_v60, %v1200_v54 }
 0xee2   :  { %2025 = vmatmul.mubr.msk.f32.vlgmr.msra.gmra.mxu1 %vm162_vm0, %v2778_v58  ;;  %v1222_v1 = vsel %vm136_vm1, %v1210_v61, 0.0  ;;  %v1223_v2 = vsel %vm136_vm1, %v1211_v62, 0.0  ;;  %1337 = vst.msk [vmem:[#allocation19] sm:$0x3] %vm136_vm1, %v1210_v61  ;;  %1338 = vst.msk [vmem:[#allocation19 + $0x2] sm:$0x3] %vm136_vm1, %v1211_v62 }
 0xee3   :  { %v1204_v3 = vld [vmem:[%s2786_s19] sm:$0x3]  ;;  %v1224_v6 = vadd.f32 %v1223_v2, %v1222_v1  ;;  %1339 = vst.msk [vmem:[#allocation19 + $0x4] sm:$0x3] %vm136_vm1, %v1212_v63  ;;  %1340 = vst.msk [vmem:[#allocation19 + $0x6] sm:$0x3] %vm136_vm1, %v1213_v0  ;;  %2046 = vmatprep.mubr.msk.f32.mxu1 %vm2334_vm2, %v2333_v20  ;;  %2039 = vmatpush3.msra.mxu1 %v1404_v40 }
 0xee4   :  { %v1214_v4 = vld [vmem:[#allocation20] sm:$0x3]  ;;  %v1215_v5 = vld [vmem:[#allocation20 + $0x2] sm:$0x3]  ;;  %v1205_v7 = vmul.f32 %v1204_v3, %v1200_v54  ;;  %v1216_v8 = vld [vmem:[#allocation20 + $0x4] sm:$0x3]  ;;  %2040 = vmatprep.subr.mxu1 %v2333_v20 }
 0xee5   :  { %v1217_v9 = vld [vmem:[#allocation20 + $0x6] sm:$0x3]  ;;  %v1218_v10 = vmul.f32 %v1214_v4, %v1200_v54  ;;  %v1219_v11 = vmul.f32 %v1215_v5, %v1200_v54  ;;  %v1225_v12 = vsel %vm136_vm1, %v1212_v63, 0.0  ;;  %v1220_v13 = vmul.f32 %v1216_v8, %v1200_v54  ;;  %2041 = vmatpush3.msra.mxu1 %v1403_v41 }
 0xee6   :  { %v1221_v14 = vmul.f32 %v1217_v9, %v1200_v54  ;;  %v1226_v15 = vadd.f32 %v1225_v12, %v1224_v6  ;;  %1317 = vrot.lane.b32.xlu1 %v1205_v7, %s2335_s29  ;;  %v1227_v16 = vsel %vm136_vm1, %v1213_v0, 0.0  ;;  %2042 = vmatprep.subr.mxu1 %v2333_v20 }
 0xee7   :  { %1341 = vst.msk [vmem:[#allocation20] sm:$0x3] %vm136_vm1, %v1218_v10  ;;  %1342 = vst.msk [vmem:[#allocation20 + $0x2] sm:$0x3] %vm136_vm1, %v1219_v11  ;;  %2043 = vmatpush3.msra.mxu1 %v1402_v42  ;;  %v1400_v11 = vld [vmem:[#allocation3 + $0xc] sm:$0x3] }
 0xee8   :  { %1343 = vst.msk [vmem:[#allocation20 + $0x4] sm:$0x3] %vm136_vm1, %v1220_v13  ;;  %1344 = vst.msk [vmem:[#allocation20 + $0x6] sm:$0x3] %vm136_vm1, %v1221_v14  ;;  %v1228_v18 = vadd.f32 %v1227_v16, %v1226_v15  ;;  %2044 = vmatprep.subr.mxu1 %v2333_v20 }
 0xee9   :  { %2045 = vmatpush3.msra.mxu1 %v1401_v17 }
 0xf58   :  { %v1318_v34 = vpop.permute.xlu1 %1317 }
 0xfa2   :  { %v1304_v21 = vpop.f32.mrf.mxu1 }
 0xfa3   :  { %v1308_v22 = vadd.f32 %v1304_v21, %v1230_v19 }
 0xfa4   :  { %v2026_v26 = vpop.f32.mrf.mxu1 }
 0xfa5   :  { %2109 = vtanh.f32 %v1308_v22  ;;  %v1874_v28 = vmul.f32 -1.442695, %v1308_v22 }
 0xfa7   :  { %2111 = vpow2.f32 %v1874_v28 }
 0xfb2   :  { %v2110_v27 = vpop.eup %2109 }
 0xfb3   :  { %1322 = vrot.lane.b32.xlu0 %v2110_v27, %s2336_s9 }
 0xfb4   :  { %v2112_v29 = vpop.eup %2111 }
 0xfb5   :  { %v1312_v30 = vadd.f32 1.0, %v2112_v29 }
 0xfb7   :  { %2113 = vrcp.f32 %v1312_v30 }
 0xfc4   :  { %v2114_v31 = vpop.eup %2113 }
 0xfc5   :  { %v1320_v35 = vmul.f32 %v2114_v31, %v1318_v34 }
0x1025   :  { %v1323_v32 = vpop.permute.xlu0 %1322 }
0x1026   :  { %v1325_v33 = vmul.f32 %v2114_v31, %v1323_v32  ;;  %v1881_v32 = vld [vmem:[%s2945_s2 + $0xe] sm:$0x3]  ;;  %s2857_s2 = scalar_lea.vmem [#allocation19], %s1882_s24 }
0x1028   :  { %1327 = vrot.lane.b32.xlu0 %v1325_v33, %s2335_s29 }
0x109a   :  { %v1328_v36 = vpop.permute.xlu0 %1327 }
0x109b   :  { %v1330_v37 = vadd.f32 %v1328_v36, %v1320_v35 }
0x109d   :  { %2115 = vtanh.f32 %v1330_v37 }
0x10aa   :  { %v2116_v38 = vpop.eup %2115 }
0x10ab   :  { %1333 = vrot.lane.b32.xlu1 %v2116_v38, %s2336_s9 }
0x10af   :  { %1369 = vperm.xlu1 %2068, %v1876_v39  }
0x111d   :  { %v1334_v43 = vpop.permute.xlu1 %1333 }
0x111e   :  { %v1336_v23 = vmul.f32 %v2114_v31, %v1334_v43 }
0x1120   :  { %1346 = vrot.lane.b32.xlu0 %v1336_v23, %s2335_s29 }
0x1124   :  { %1351 = vrot.lane.b32.xlu0 %v1330_v37, %s2337_s16 }
0x112a   :  { %v1370_v49 = vpop.permute.xlu1 %1369 }
0x1192   :  { %v1347_v44 = vpop.permute.xlu0 %1346 }
0x1193   :  { %v1355_v45 = vadd.f32 %v1347_v44, %v1228_v18  ;;  %1349 = vst.msk [vmem:[%s2775_s18] sm:$0x3] %vm136_vm1, %v1347_v44 }
0x1195   :  { %v1356_v46 = vsub.f32 %v1355_v45, %v2778_v58 }
0x1196   :  { %v1352_v47 = vpop.permute.xlu0 %1351 }
0x1197   :  { %v1357_v48 = vmul.f32 0.25, %v1356_v46  ;;  %1354 = vst.msk [vmem:[%s2786_s19] sm:$0x3] %vm136_vm1, %v1352_v47 }
0x1199   :  { %1359 = vst.msk [vmem:[#allocation4 + $0xa] sm:$0x3] %vm136_vm1, %v1357_v48 }
0x119a   :  { %v1366_v50 = vld [vmem:[%s2820_s21] sm:$0x3]  ;;  %v1376_v24 = vld [vmem:[#allocation19] sm:$0x3]  ;;  %v1377_v51 = vld [vmem:[#allocation19 + $0x2] sm:$0x3] }
0x119b   :  { %v2823_v52 = vmul.f32 %v1370_v49, %v1366_v50  ;;  %v1378_v25 = vld [vmem:[#allocation19 + $0x4] sm:$0x3]  ;;  %v1379_v53 = vld [vmem:[#allocation19 + $0x6] sm:$0x3]  ;;  %v1380_v54 = vmul.f32 %v1376_v24, %v1370_v49  ;;  %v1381_v55 = vmul.f32 %v1377_v51, %v1370_v49 }
0x119c   :  { %v1382_v56 = vmul.f32 %v1378_v25, %v1370_v49  ;;  %v1383_v57 = vmul.f32 %v1379_v53, %v1370_v49 }
0x119d   :  { %2036 = vmatmul.mubr.msk.f32.vlgmr.msra.gmra.mxu0 %vm162_vm0, %v2823_v52  ;;  %v1392_v58 = vsel %vm136_vm1, %v1380_v54, 0.0  ;;  %v1393_v59 = vsel %vm136_vm1, %v1381_v55, 0.0  ;;  %1507 = vst.msk [vmem:[#allocation19] sm:$0x3] %vm136_vm1, %v1380_v54  ;;  %1508 = vst.msk [vmem:[#allocation19 + $0x2] sm:$0x3] %vm136_vm1, %v1381_v55 }
0x119e   :  { %v1374_v60 = vld [vmem:[%s2831_s8] sm:$0x3]  ;;  %v1394_v63 = vadd.f32 %v1393_v59, %v1392_v58  ;;  %1509 = vst.msk [vmem:[#allocation19 + $0x4] sm:$0x3] %vm136_vm1, %v1382_v56  ;;  %1510 = vst.msk [vmem:[#allocation19 + $0x6] sm:$0x3] %vm136_vm1, %v1383_v57 }
0x119f   :  { %v1384_v61 = vld [vmem:[#allocation20] sm:$0x3]  ;;  %v1385_v62 = vld [vmem:[#allocation20 + $0x2] sm:$0x3]  ;;  %v1375_v0 = vmul.f32 %v1374_v60, %v1370_v49  ;;  %v1386_v1 = vld [vmem:[#allocation20 + $0x4] sm:$0x3] }
0x11a0   :  { %v1387_v2 = vld [vmem:[#allocation20 + $0x6] sm:$0x3]  ;;  %v1388_v3 = vmul.f32 %v1384_v61, %v1370_v49  ;;  %v1389_v4 = vmul.f32 %v1385_v62, %v1370_v49  ;;  %v1395_v5 = vsel %vm136_vm1, %v1382_v56, 0.0  ;;  %v1390_v6 = vmul.f32 %v1386_v1, %v1370_v49 }
0x11a1   :  { %v1391_v7 = vmul.f32 %v1387_v2, %v1370_v49  ;;  %v1396_v8 = vadd.f32 %v1395_v5, %v1394_v63  ;;  %1487 = vrot.lane.b32.xlu0 %v1375_v0, %s2335_s29  ;;  %v1397_v9 = vsel %vm136_vm1, %v1383_v57, 0.0  ;;  %v1570_v0 = vld [vmem:[#allocation3 + $0xe] sm:$0x3] }
0x11a2   :  { %1511 = vst.msk [vmem:[#allocation20] sm:$0x3] %vm136_vm1, %v1388_v3  ;;  %1512 = vst.msk [vmem:[#allocation20 + $0x2] sm:$0x3] %vm136_vm1, %v1389_v4 }
0x11a3   :  { %1513 = vst.msk [vmem:[#allocation20 + $0x4] sm:$0x3] %vm136_vm1, %v1390_v6  ;;  %1514 = vst.msk [vmem:[#allocation20 + $0x6] sm:$0x3] %vm136_vm1, %v1391_v7  ;;  %v1398_v10 = vadd.f32 %v1397_v9, %v1396_v8 }
0x1213   :  { %v1488_v27 = vpop.permute.xlu0 %1487 }
0x125d   :  { %v1474_v12 = vpop.f32.mrf.mxu0 }
0x125e   :  { %v1478_v13 = vadd.f32 %v1474_v12, %v1400_v11 }
0x125f   :  { %v2037_v14 = vpop.f32.mrf.mxu0 }
0x1260   :  { %2117 = vtanh.f32 %v1478_v13  ;;  %v1879_v16 = vmul.f32 -1.442695, %v1478_v13 }
0x1262   :  { %2119 = vpow2.f32 %v1879_v16  ;;  %v2883_v16 = vld [vmem:[#allocation4] sm:$0xff] }
0x126d   :  { %v2118_v15 = vpop.eup %2117 }
0x126e   :  { %1492 = vrot.lane.b32.xlu1 %v2118_v15, %s2336_s9 }
0x126f   :  { %v2120_v18 = vpop.eup %2119 }
0x1270   :  { %v1482_v19 = vadd.f32 1.0, %v2120_v18  ;;  %v1885_v18 = vld [vmem:[#allocation17] ss:$0 sm:$0xff] }
0x1272   :  { %2121 = vrcp.f32 %v1482_v19  ;;  %v1709_v19 = vmul.f32 %v1885_v18, %v2883_v16 }
0x127f   :  { %v2122_v21 = vpop.eup %2121 }
0x1280   :  { %v1490_v28 = vmul.f32 %v2122_v21, %v1488_v27 }
0x12e0   :  { %v1493_v22 = vpop.permute.xlu1 %1492 }
0x12e1   :  { %v1495_v26 = vmul.f32 %v2122_v21, %v1493_v22  ;;  %v1743_v22 = vld [vmem:[#allocation2 + $0x8] sm:$0xff] }
0x12e3   :  { %1497 = vrot.lane.b32.xlu1 %v1495_v26, %s2335_s29 }
0x1355   :  { %v1498_v29 = vpop.permute.xlu1 %1497 }
0x1356   :  { %v1500_v30 = vadd.f32 %v1498_v29, %v1490_v28 }
0x1358   :  { %2123 = vtanh.f32 %v1500_v30 }
0x1365   :  { %v2124_v31 = vpop.eup %2123 }
0x1366   :  { %1503 = vrot.lane.b32.xlu0 %v2124_v31, %s2336_s9 }
0x136a   :  { %1539 = vperm.xlu0 %2067, %v1881_v32  }
0x13d8   :  { %v1504_v33 = vpop.permute.xlu0 %1503 }
0x13d9   :  { %v1506_v34 = vmul.f32 %v2122_v21, %v1504_v33  ;;  %v1711_v21 = vsel %vm162_vm0, %v1709_v19, 0.0 }
0x13db   :  { %1516 = vrot.lane.b32.xlu1 %v1506_v34, %s2335_s29 }
0x13df   :  { %1521 = vrot.lane.b32.xlu1 %v1500_v30, %s2337_s16 }
0x13e5   :  { %v1540_v40 = vpop.permute.xlu0 %1539 }
0x144d   :  { %v1517_v35 = vpop.permute.xlu1 %1516 }
0x144e   :  { %v1525_v36 = vadd.f32 %v1517_v35, %v1398_v10  ;;  %1519 = vst.msk [vmem:[%s2820_s21] sm:$0x3] %vm136_vm1, %v1517_v35 }
0x1450   :  { %v1526_v37 = vsub.f32 %v1525_v36, %v2823_v52 }
0x1451   :  { %v1522_v38 = vpop.permute.xlu1 %1521 }
0x1452   :  { %v1527_v39 = vmul.f32 0.25, %v1526_v37  ;;  %1524 = vst.msk [vmem:[%s2831_s8] sm:$0x3] %vm136_vm1, %v1522_v38 }
0x1454   :  { %1529 = vst.msk [vmem:[#allocation4 + $0xc] sm:$0x3] %vm136_vm1, %v1527_v39 }
0x1455   :  { %v1536_v41 = vld [vmem:[%s2857_s2] sm:$0x3]  ;;  %v1546_v42 = vld [vmem:[#allocation19] sm:$0x3]  ;;  %v1547_v17 = vld [vmem:[#allocation19 + $0x2] sm:$0x3] }
0x1456   :  { %v2860_v43 = vmul.f32 %v1540_v40, %v1536_v41  ;;  %v1548_v23 = vld [vmem:[#allocation19 + $0x4] sm:$0x3]  ;;  %v1549_v44 = vld [vmem:[#allocation19 + $0x6] sm:$0x3]  ;;  %v1550_v45 = vmul.f32 %v1546_v42, %v1540_v40  ;;  %v1551_v46 = vmul.f32 %v1547_v17, %v1540_v40  ;;  %v1886_v42 = vld [vmem:[#allocation7] ss:$0 sm:$0xff] }
0x1457   :  { %v1552_v47 = vmul.f32 %v1548_v23, %v1540_v40  ;;  %v1553_v48 = vmul.f32 %v1549_v44, %v1540_v40  ;;  %v1742_v17 = vld [vmem:[#allocation2] sm:$0xff] }
0x1458   :  { %2047 = vmatmul.mubr.msk.f32.vlgmr.msra.gmra.mxu1 %vm162_vm0, %v2860_v43  ;;  %v1562_v49 = vsel %vm136_vm1, %v1550_v45, 0.0  ;;  %v1563_v50 = vsel %vm136_vm1, %v1551_v46, 0.0  ;;  %1677 = vst.msk [vmem:[#allocation19] sm:$0x3] %vm136_vm1, %v1550_v45  ;;  %1678 = vst.msk [vmem:[#allocation19 + $0x2] sm:$0x3] %vm136_vm1, %v1551_v46 }
0x1459   :  { %v1544_v24 = vld [vmem:[%s2868_s25] sm:$0x3]  ;;  %v1564_v25 = vadd.f32 %v1563_v50, %v1562_v49  ;;  %1679 = vst.msk [vmem:[#allocation19 + $0x4] sm:$0x3] %vm136_vm1, %v1552_v47  ;;  %1680 = vst.msk [vmem:[#allocation19 + $0x6] sm:$0x3] %vm136_vm1, %v1553_v48 }
0x145a   :  { %v1554_v51 = vld [vmem:[#allocation20] sm:$0x3]  ;;  %v1555_v52 = vld [vmem:[#allocation20 + $0x2] sm:$0x3]  ;;  %v1545_v53 = vmul.f32 %v1544_v24, %v1540_v40  ;;  %v1556_v54 = vld [vmem:[#allocation20 + $0x4] sm:$0x3] }
0x145b   :  { %v1557_v55 = vld [vmem:[#allocation20 + $0x6] sm:$0x3]  ;;  %v1558_v56 = vmul.f32 %v1554_v51, %v1540_v40  ;;  %v1559_v57 = vmul.f32 %v1555_v52, %v1540_v40  ;;  %v1565_v58 = vsel %vm136_vm1, %v1552_v47, 0.0  ;;  %v1560_v59 = vmul.f32 %v1556_v54, %v1540_v40 }
0x145c   :  { %v1561_v60 = vmul.f32 %v1557_v55, %v1540_v40  ;;  %v1566_v61 = vadd.f32 %v1565_v58, %v1564_v25  ;;  %1657 = vrot.lane.b32.xlu1 %v1545_v53, %s2335_s29  ;;  %v1567_v62 = vsel %vm136_vm1, %v1553_v48, 0.0  ;;  %v1726_v40 = vmul.f32 %v2883_v16, %v2883_v16 }
0x145d   :  { %1681 = vst.msk [vmem:[#allocation20] sm:$0x3] %vm136_vm1, %v1558_v56  ;;  %1682 = vst.msk [vmem:[#allocation20 + $0x2] sm:$0x3] %vm136_vm1, %v1559_v57 }
0x145e   :  { %1683 = vst.msk [vmem:[#allocation20 + $0x4] sm:$0x3] %vm136_vm1, %v1560_v59  ;;  %1684 = vst.msk [vmem:[#allocation20 + $0x6] sm:$0x3] %vm136_vm1, %v1561_v60  ;;  %v1568_v63 = vadd.f32 %v1567_v62, %v1566_v61  ;;  %v1728_v41 = vsel %vm162_vm0, %v1726_v40, 0.0 }
0x14ce   :  { %v1658_v11 = vpop.permute.xlu1 %1657 }
0x1518   :  { %v1644_v1 = vpop.f32.mrf.mxu1 }
0x1519   :  { %v1648_v2 = vadd.f32 %v1644_v1, %v1570_v0 }
0x151a   :  { %v2048_v3 = vpop.f32.mrf.mxu1 }
0x151b   :  { %2125 = vtanh.f32 %v1648_v2  ;;  %v1884_v5 = vmul.f32 -1.442695, %v1648_v2 }
0x151d   :  { %2127 = vpow2.f32 %v1884_v5 }
0x1528   :  { %v2126_v4 = vpop.eup %2125 }
0x1529   :  { %1662 = vrot.lane.b32.xlu0 %v2126_v4, %s2336_s9 }
0x152a   :  { %v2128_v6 = vpop.eup %2127 }
0x152b   :  { %v1652_v7 = vadd.f32 1.0, %v2128_v6 }
0x152d   :  { %2129 = vrcp.f32 %v1652_v7 }
0x153a   :  { %v2130_v8 = vpop.eup %2129 }
0x153b   :  { %v1660_v12 = vmul.f32 %v2130_v8, %v1658_v11 }
0x159b   :  { %v1663_v9 = vpop.permute.xlu0 %1662 }
0x159c   :  { %v1665_v10 = vmul.f32 %v2130_v8, %v1663_v9 }
0x159e   :  { %1667 = vrot.lane.b32.xlu0 %v1665_v10, %s2335_s29 }
0x1610   :  { %v1668_v13 = vpop.permute.xlu0 %1667 }
0x1611   :  { %v1670_v14 = vadd.f32 %v1668_v13, %v1660_v12 }
0x1613   :  { %2131 = vtanh.f32 %v1670_v14 }
0x1620   :  { %v2132_v15 = vpop.eup %2131 }
0x1621   :  { %1673 = vrot.lane.b32.xlu1 %v2132_v15, %s2336_s9 }
0x1645   :  { %1712 = vadd.xlane.f32.xlu1 %v1711_v21 }
0x1656   :  { %1748 = vrot.lane.b32.xlu1 %v1743_v22, %s2335_s29 }
0x165a   :  { %1691 = vrot.lane.b32.xlu1 %v1670_v14, %s2337_s16  ;;  %s2338_s16 = smov [#allocation19]  }
0x165b   :  { %s1776_s26 = sshll.u32 %s2338_s16, 4  ;;  %s1777_s26 = int_to_ptr.vmem [resolvable:$true] %s1776_s26 }
0x165c   :  { %s2269_s4 = scalar_lea.vmem %s1777_s26, 128  ;;  %p2274_p8 = scmp.lt.s32.totalorder %s1777_s26, %s1777_s26 }
0x165d   :  { %p2270_p7 = scmp.ne.s32.totalorder %s1777_s26, %s2269_s4  ;;  %p2275_p9 = scmp.lt.s32.totalorder %s2269_s4, %s2269_s4 }
0x165f   :  { %p2276_p10 = por %p2275_p9, %p2274_p8 }
0x1661   :  { %p2277_p11 = pnand %p2276_p10, %p2270_p7 }
0x1693   :  { %v1674_v26 = vpop.permute.xlu1 %1673 }
0x1694   :  { %v1676_v27 = vmul.f32 %v2130_v8, %v1674_v26 }
0x1696   :  { %1686 = vrot.lane.b32.xlu0 %v1676_v27, %s2335_s29 }
0x16ce   :  { %v1713_v28 = vpop.xlane.xlu1 %1712 }
0x16d2   :  { %v1749_v29 = vpop.permute.xlu1 %1748 }
0x16d6   :  { %v1692_v30 = vpop.permute.xlu1 %1691 }
0x16d7   :  { %1694 = vst.msk [vmem:[%s2868_s25] sm:$0x3] %vm136_vm1, %v1692_v30 }
0x1708   :  { %v1687_v31 = vpop.permute.xlu0 %1686 }
0x1709   :  { %v1695_v32 = vadd.f32 %v1687_v31, %v1568_v63  ;;  %1689 = vst.msk [vmem:[%s2857_s2] sm:$0x3] %vm136_vm1, %v1687_v31 }
0x170b   :  { %v1696_v33 = vsub.f32 %v1695_v32, %v2860_v43  ;;  %v1724_v43 = vadd.f32 %v1886_v42, %v1713_v28 }
0x170d   :  { %v1697_v34 = vmul.f32 0.25, %v1696_v33 }
0x170f   :  { %1699 = vst.msk [vmem:[#allocation4 + $0xe] sm:$0x3] %vm136_vm1, %v1697_v34 }
0x1716   :  { %v1701_v35 = vld [vmem:[#allocation4 + $0x8] sm:$0xff] }
0x1717   :  { %v1727_v36 = vmul.f32 %v1701_v35, %v1701_v35  ;;  %v1710_v37 = vmul.f32 %v1885_v18, %v1701_v35 }
0x1719   :  { %v1731_v38 = vsel %vm162_vm0, %v1727_v36, 0.0  ;;  %v1714_v39 = vsel %vm162_vm0, %v1710_v37, 0.0 }
0x171a   :  { %1732 = vadd.xlane.f32.xlu1 %v1731_v38  ;;  %1715 = vadd.xlane.f32.xlu0 %v1714_v39 }
0x171e   :  { %1729 = vadd.xlane.f32.xlu0 %v1728_v41 }
0x1734   :  { %1746 = vrot.lane.b32.xlu0 %v1742_v17, %s2335_s29 }
0x1738   :  { %1757 = vrot.lane.b32.xlu0 %v1724_v43, %s2336_s9 }
0x1739   :  { %2280 = shalt.err (!%p2277_p11)
}
0x173a   :  { %s2340_s28 = smov 2   ;;  %s2289_s30 = scalar_lea.vmem %s1789_s27, 128 }
0x173b   :  { %1782 = dma.vmem_to_hbm [thread:$0]  %s1777_s26, 128, %s2955_s13, [#allocation10], %s2335_s29, %s2335_s29, %s2340_s28  }
0x173c   :  { %p2290_p12 = scmp.ne.s32.totalorder %s1789_s27, %s2289_s30  ;;  %p2294_p13 = scmp.lt.s32.totalorder %s1789_s27, %s1789_s27 }
0x173d   :  { %p2295_p0 = scmp.lt.s32.totalorder %s2289_s30, %s2289_s30 }
0x173f   :  { %p2296_p1 = por %p2295_p0, %p2294_p13 }
0x1741   :  { %p2297_p2 = pnand %p2296_p1, %p2290_p12 }
0x1743   :  { %2300 = shalt.err (!%p2297_p2)
}
0x1744   :  { %1794 = dma.vmem_to_hbm [thread:$0]  %s1789_s27, 128, %s2956_s14, [#allocation21], %s2335_s29, %s2335_s29, %s2340_s28   ;;  %vm1752_vm3 = vcmask 523520   ;;  %vm1763_vm4 = vcmask 531968   ;;  %vm1766_vm5 = vcmask 1048072  }
0x17a3   :  { %v1716_v23 = vpop.xlane.xlu0 %1715  ;;  %v1733_v44 = vpop.xlane.xlu1 %1732 }
0x17a4   :  { %v1725_v45 = vadd.f32 %v1886_v42, %v1716_v23  ;;  %v1735_v46 = vmax.f32 %v1733_v44, 1e-24 }
0x17a6   :  { %2133 = vrsqrt.f32 %v1735_v46  ;;  %1759 = vrot.lane.b32.xlu1 %v1725_v45, %s2336_s9 }
0x17a7   :  { %v1730_v47 = vpop.xlane.xlu0 %1729 }
0x17a8   :  { %v1734_v48 = vmax.f32 %v1730_v47, 1e-24 }
0x17aa   :  { %2135 = vrsqrt.f32 %v1734_v48 }
0x17ab   :  { %v1747_v24 = vpop.permute.xlu0 %1746 }
0x17af   :  { %v1758_v25 = vpop.permute.xlu0 %1757 }
0x17b3   :  { %v2134_v49 = vpop.eup %2133 }
0x17b4   :  { %v1739_v50 = vmul.f32 %v2134_v49, %v1701_v35 }
0x17b6   :  { %1741 = vst.msk [vmem:[%s2954_s12 + $0x8] sm:$0xff] %vm162_vm0, %v1739_v50 }
0x17b7   :  { %v2136_v51 = vpop.eup %2135  ;;  %1754 = vst.msk [vmem:[%s2954_s12 + $0x8] sm:$0xff] %vm1752_vm3, %v1749_v29 }
0x17b8   :  { %v1738_v52 = vmul.f32 %v2136_v51, %v2883_v16 }
0x17ba   :  { %1740 = vst.msk [vmem:[%s2954_s12] sm:$0xff] %vm162_vm0, %v1738_v52 }
0x17bb   :  { %1753 = vst.msk [vmem:[%s2954_s12] sm:$0xff] %vm1752_vm3, %v1747_v24 }
0x17bc   :  { %1764 = vst.msk [vmem:[%s2954_s12] sm:$0xff] %vm1763_vm4, %v1758_v25 }
0x17bd   :  { %1767 = vst.msk [vmem:[%s2954_s12] sm:$0xff] %vm1766_vm5, %v2333_v20 }
0x1818   :  { %v1760_v53 = vpop.permute.xlu1 %1759 }
0x1819   :  { %1765 = vst.msk [vmem:[%s2954_s12 + $0x8] sm:$0xff] %vm1763_vm4, %v1760_v53 }
0x181a   :  { %1768 = vst.msk [vmem:[%s2954_s12 + $0x8] sm:$0xff] %vm1766_vm5, %v2333_v20 }
0x181b   :  { %2319 = dma.done.wait [#allocation10], 128  }
0x181c   :  { %2320 = vsyncadd [#allocation10], 4294967168 }
0x181d   :  { %2321 = dma.done.wait [#allocation21], 128  }
0x181e   :  { %2322 = vsyncadd [#allocation21], 4294967168 }
0x181f   :  { %1803 = vsyncpa [#allocation9], 1 }
0x1820   :  { %1804 = vsyncpa [#allocation12], 1 }
0x1821   :  { %1805 = vsyncpa [#allocation15], 1 }
0x1822   :  { %1806 = vsyncpa [#allocation18], 1 }
0x1823   :  { %1807 = vsyncpa [#allocation10], 1 }
0x1824   :  { %1808 = vsyncpa [#allocation21], 1 }

</bundles_post_ra>
